<compile_context>
chip_gen: v5e
topology: v5e:2x2
jax: 0.10.0
libtpu: 0.0.40
codegen_flags: <defaults>
</compile_context>

<pallas_src>
import math

import jax
import jax.numpy as jnp
from jax.experimental import pallas as pl
from jax.experimental.pallas import tpu as pltpu

# ---- small synthetic config (BERT-shaped, scaled down) ----
B, S = 2, 8                # batch, sequence length
H, NH, HD = 32, 2, 16      # hidden, heads, head dim
I = 64                     # intermediate (FFN) size
VOCAB, MAX_POS, TYPE_VOCAB = 100, 16, 2
LAYERS = 2
NUM_CLASSES = 60
C_PAD = 128                # classifier output padded to a full lane width
QKV = 3 * H                # 96
QKV_PAD = 128              # fused q|k|v weight padded to a full lane width
I_PAD = 128                # FFN intermediate padded to a full lane width
LN_EPS = 1e-12
BS = B * S

assert S <= MAX_POS


def _layernorm(x, gamma, beta):
    # One-pass statistics: var = E[x^2] - E[x]^2 (one cross-lane reduce fewer).
    mu = jnp.mean(x, axis=-1, keepdims=True)
    var = jnp.mean(x * x, axis=-1, keepdims=True) - mu * mu
    return (x - mu) * jax.lax.rsqrt(var + LN_EPS) * gamma + beta


# ---------------- fused Pallas kernel (single grid step) ----------------

def bert_fused_kernel(
        x_emb_ref, mask_ref, emb_g_ref, emb_b_ref,
        wqkv_ref, bqkv_ref, wo_ref, bo_ref, g1_ref, be1_ref,
        wi_ref, bi_ref, wf_ref, bf_ref, g2_ref, be2_ref,
        wp_ref, bp_ref, wc_ref, bc_ref,
        logits_ref,
        ctx_sc):
    inv_sqrt_d = 1.0 / math.sqrt(HD)

    # ---- embedding LayerNorm over the whole (B*S, H) slab ----
    x = _layernorm(x_emb_ref[...], emb_g_ref[...], emb_b_ref[...])   # (BS, H) f32

    # ---- encoder layers: static unroll, all weights resident in VMEM ----
    for l in range(LAYERS):
        x_bf = x.astype(jnp.bfloat16)

        # Fused Q|K|V projection: one (16,32)x(32,128) MXU matmul + one bias add.
        qkv = jnp.dot(x_bf, wqkv_ref[l],
                      preferred_element_type=jnp.float32) + bqkv_ref[l]   # (BS, 128)
        q_bf = (qkv[:, 0:H] * inv_sqrt_d).astype(jnp.bfloat16)   # pre-scaled once
        kv_bf = qkv[:, H:3 * H].astype(jnp.bfloat16)
        k_bf = kv_bf[:, 0:H]
        v_bf = kv_bf[:, H:2 * H]

        # Attention per sequence / per head (B=2, NH=2: tiny static unroll).
        for b in range(B):
            rs = slice(b * S, (b + 1) * S)
            mask_b = mask_ref[b]                                  # (S, S) additive
            for h in range(NH):
                cs = slice(h * HD, (h + 1) * HD)
                sc = jnp.einsum('qd,kd->qk', q_bf[rs, cs], k_bf[rs, cs],
                                preferred_element_type=jnp.float32)
                sc = sc + mask_b
                sc = sc - jnp.max(sc, axis=-1, keepdims=True)
                p = jnp.exp(sc)
                p = p * pl.reciprocal(jnp.sum(p, axis=-1, keepdims=True),
                                      approx=True)
                ctx_sc[rs, cs] = jnp.dot(p.astype(jnp.bfloat16), v_bf[rs, cs],
                                         preferred_element_type=jnp.float32)

        attn = jnp.dot(ctx_sc[...].astype(jnp.bfloat16), wo_ref[l],
                       preferred_element_type=jnp.float32) + bo_ref[l]
        h1 = _layernorm(x + attn, g1_ref[l], be1_ref[l])

        # FFN (intermediate padded to 128 lanes; padded lanes stay exactly zero).
        ff = jnp.dot(h1.astype(jnp.bfloat16), wi_ref[l],
                     preferred_element_type=jnp.float32) + bi_ref[l]      # (BS, 128)
        # TODO(synk): BERT uses exact (erf) GELU; tanh-approximate GELU used here.
        ff = jax.nn.gelu(ff, approximate=True)
        ff = jnp.dot(ff.astype(jnp.bfloat16), wf_ref[l],
                     preferred_element_type=jnp.float32) + bf_ref[l]      # (BS, H)

        x = _layernorm(h1 + ff, g2_ref[l], be2_ref[l])

    # ---- pooler (tanh on [CLS]) + dropout/ReLU/dropout head + classifier ----
    cls = jnp.concatenate([x[b * S:b * S + 1, :] for b in range(B)], axis=0)  # (B,H)
    pooled = jnp.tanh(
        jnp.dot(cls.astype(jnp.bfloat16), wp_ref[...],
                preferred_element_type=jnp.float32) + bp_ref[...])
    # nn.Dropout(0.3) / nn.Dropout(0.1) are identity at inference; ReLU kept.
    act = jnp.maximum(pooled, 0.0)
    logits_ref[...] = jnp.dot(act.astype(jnp.bfloat16), wc_ref[...],
                              preferred_element_type=jnp.float32) + bc_ref[...]


# ---------------- wrapper ----------------

def emotion_classifier_forward(params, input_ids, attention_mask):
    # Embedding lookups (gather) are glue in plain JAX.
    # token_type embedding: all token_type_ids are 0 (single-segment input).
    emb = (params['word_emb'][input_ids]
           + params['pos_emb'][:S][None, :, :]
           + params['type_emb'][0][None, None, :]).astype(jnp.float32)   # (B, S, H)
    emb = emb.reshape(BS, H)

    # Additive attention mask precomputed once as a full (B, S, S) tensor so no
    # per-head broadcast is emitted inside the kernel.
    add_mask = jnp.broadcast_to(
        ((1.0 - attention_mask.astype(jnp.float32)) * (-1e9))[:, None, :],
        (B, S, S))

    fm2 = lambda i: (0, 0)        # full-array 2-D blocks
    fm3 = lambda i: (0, 0, 0)     # full-array 3-D blocks

    in_specs = [
        pl.BlockSpec((BS, H), fm2),                 # x_emb
        pl.BlockSpec((B, S, S), fm3),               # additive mask
        pl.BlockSpec((1, H), fm2),                  # emb_g
        pl.BlockSpec((1, H), fm2),                  # emb_b
        pl.BlockSpec((LAYERS, H, QKV_PAD), fm3),    # wqkv (fused q|k|v, lane-padded)
        pl.BlockSpec((LAYERS, 1, QKV_PAD), fm3),    # bqkv
        pl.BlockSpec((LAYERS, H, H), fm3),          # wo
        pl.BlockSpec((LAYERS, 1, H), fm3),          # bo
        pl.BlockSpec((LAYERS, 1, H), fm3),          # g1
        pl.BlockSpec((LAYERS, 1, H), fm3),          # be1
        pl.BlockSpec((LAYERS, H, I_PAD), fm3),      # wi (lane-padded)
        pl.BlockSpec((LAYERS, 1, I_PAD), fm3),      # bi
        pl.BlockSpec((LAYERS, I_PAD, H), fm3),      # wf (row-padded)
        pl.BlockSpec((LAYERS, 1, H), fm3),          # bf
        pl.BlockSpec((LAYERS, 1, H), fm3),          # g2
        pl.BlockSpec((LAYERS, 1, H), fm3),          # be2
        pl.BlockSpec((H, H), fm2),                  # wp (pooler)
        pl.BlockSpec((1, H), fm2),                  # bp
        pl.BlockSpec((H, C_PAD), fm2),              # wc (classifier, lane-padded)
        pl.BlockSpec((1, C_PAD), fm2),              # bc
    ]
    out_spec = pl.BlockSpec((B, C_PAD), fm2)

    logits_pad = pl.pallas_call(
        bert_fused_kernel,
        out_shape=jax.ShapeDtypeStruct((B, C_PAD), jnp.float32),
        grid_spec=pltpu.PrefetchScalarGridSpec(
            num_scalar_prefetch=0,
            grid=(1,),                              # single step: no grid overhead
            in_specs=in_specs,
            out_specs=out_spec,
            scratch_shapes=[pltpu.VMEM((BS, H), jnp.float32)],  # head-context buf
        ),
        compiler_params=pltpu.CompilerParams(
            dimension_semantics=("arbitrary",)),
    )(emb, add_mask, params['emb_g'], params['emb_b'],
      params['wqkv'], params['bqkv'], params['wo'], params['bo'],
      params['g1'], params['be1'],
      params['wi'], params['bi'], params['wf'], params['bf'],
      params['g2'], params['be2'],
      params['wp'], params['bp'], params['wc'], params['bc'])

    # Slice the lane-padded logits back to the 60 real classes.
    return logits_pad[:, :NUM_CLASSES]


def init_params(key):
    def nrm(k, shape):
        return 0.02 * jax.random.normal(k, shape, dtype=jnp.float32)

    keys = iter(jax.random.split(key, 16))

    # Fused q|k|v weight, padded to 128 lanes (padding columns are zero).
    wq = nrm(next(keys), (LAYERS, H, H))
    wk = nrm(next(keys), (LAYERS, H, H))
    wv = nrm(next(keys), (LAYERS, H, H))
    wqkv = jnp.zeros((LAYERS, H, QKV_PAD), jnp.float32)
    wqkv = wqkv.at[:, :, :QKV].set(jnp.concatenate([wq, wk, wv], axis=-1))

    wi = jnp.zeros((LAYERS, H, I_PAD), jnp.float32)
    wi = wi.at[:, :, :I].set(nrm(next(keys), (LAYERS, H, I)))
    wf = jnp.zeros((LAYERS, I_PAD, H), jnp.float32)
    wf = wf.at[:, :I, :].set(nrm(next(keys), (LAYERS, I, H)))

    wc = jnp.zeros((H, C_PAD), jnp.float32)
    wc = wc.at[:, :NUM_CLASSES].set(nrm(next(keys), (H, NUM_CLASSES)))

    params = {
        'word_emb': nrm(next(keys), (VOCAB, H)),
        'pos_emb': nrm(next(keys), (MAX_POS, H)),
        'type_emb': nrm(next(keys), (TYPE_VOCAB, H)),
        'emb_g': jnp.ones((1, H), jnp.float32),
        'emb_b': jnp.zeros((1, H), jnp.float32),
        # stacked per-layer encoder params (matmul weights bf16, bias/LN f32)
        'wqkv': wqkv.astype(jnp.bfloat16),
        'bqkv': jnp.zeros((LAYERS, 1, QKV_PAD), jnp.float32),
        'wo': nrm(next(keys), (LAYERS, H, H)).astype(jnp.bfloat16),
        'bo': jnp.zeros((LAYERS, 1, H), jnp.float32),
        'g1': jnp.ones((LAYERS, 1, H), jnp.float32),
        'be1': jnp.zeros((LAYERS, 1, H), jnp.float32),
        'wi': wi.astype(jnp.bfloat16),
        'bi': jnp.zeros((LAYERS, 1, I_PAD), jnp.float32),
        'wf': wf.astype(jnp.bfloat16),
        'bf': jnp.zeros((LAYERS, 1, H), jnp.float32),
        'g2': jnp.ones((LAYERS, 1, H), jnp.float32),
        'be2': jnp.zeros((LAYERS, 1, H), jnp.float32),
        # pooler + classifier (classifier padded to a full 128-lane output)
        'wp': nrm(next(keys), (H, H)).astype(jnp.bfloat16),
        'bp': jnp.zeros((1, H), jnp.float32),
        'wc': wc.astype(jnp.bfloat16),
        'bc': jnp.zeros((1, C_PAD), jnp.float32),
    }
    return params


if __name__ == "__main__":
    key = jax.random.PRNGKey(0)
    k_param, k_ids = jax.random.split(key)

    params = init_params(k_param)
    input_ids = jax.random.randint(k_ids, (B, S), 0, VOCAB, dtype=jnp.int32)
    # Second sequence has 3 padding tokens at the end.
    attention_mask = jnp.array(
        [[1, 1, 1, 1, 1, 1, 1, 1],
         [1, 1, 1, 1, 1, 0, 0, 0]], dtype=jnp.int32)

    logits = jax.jit(emotion_classifier_forward)(params, input_ids, attention_mask)
    logits = jax.block_until_ready(logits)

    assert logits.shape == (B, NUM_CLASSES), logits.shape
    assert logits.dtype == jnp.float32
    assert bool(jnp.all(jnp.isfinite(logits)))
    print("KERNEL_OK")
</pallas_src>

<mosaic_0001>
module attributes {stable_mosaic.version = 11 : i64} {
  func.func @bert_fused_kernel(%arg0: i32, %arg1: memref<16x32xf32, #tpu.memory_space<vmem>>, %arg2: memref<2x8x8xf32, #tpu.memory_space<vmem>>, %arg3: memref<1x32xf32, #tpu.memory_space<vmem>>, %arg4: memref<1x32xf32, #tpu.memory_space<vmem>>, %arg5: memref<2x32x128xbf16, #tpu.memory_space<vmem>>, %arg6: memref<2x1x128xf32, #tpu.memory_space<vmem>>, %arg7: memref<2x32x32xbf16, #tpu.memory_space<vmem>>, %arg8: memref<2x1x32xf32, #tpu.memory_space<vmem>>, %arg9: memref<2x1x32xf32, #tpu.memory_space<vmem>>, %arg10: memref<2x1x32xf32, #tpu.memory_space<vmem>>, %arg11: memref<2x32x128xbf16, #tpu.memory_space<vmem>>, %arg12: memref<2x1x128xf32, #tpu.memory_space<vmem>>, %arg13: memref<2x128x32xbf16, #tpu.memory_space<vmem>>, %arg14: memref<2x1x32xf32, #tpu.memory_space<vmem>>, %arg15: memref<2x1x32xf32, #tpu.memory_space<vmem>>, %arg16: memref<2x1x32xf32, #tpu.memory_space<vmem>>, %arg17: memref<32x32xbf16, #tpu.memory_space<vmem>>, %arg18: memref<1x32xf32, #tpu.memory_space<vmem>>, %arg19: memref<32x128xbf16, #tpu.memory_space<vmem>>, %arg20: memref<1x128xf32, #tpu.memory_space<vmem>>, %arg21: memref<2x128xf32, #tpu.memory_space<vmem>>, %arg22: memref<16x32xf32, #tpu.memory_space<vmem>>) attributes {dimension_semantics = [#tpu.dimension_semantics<arbitrary>], iteration_bounds = array<i64: 1>, scalar_prefetch = 0 : i64, scratch_operands = 1 : i64, tpu.core_type = #tpu.core_type<tc>, window_params = [{pipeline_mode = #tpu.pipeline_mode<synchronous>, transform_indices = @transform_0, window_bounds = array<i64: 16, 32>}, {pipeline_mode = #tpu.pipeline_mode<synchronous>, transform_indices = @transform_1, window_bounds = array<i64: 2, 8, 8>}, {pipeline_mode = #tpu.pipeline_mode<synchronous>, transform_indices = @transform_2, window_bounds = array<i64: 1, 32>}, {pipeline_mode = #tpu.pipeline_mode<synchronous>, transform_indices = @transform_3, window_bounds = array<i64: 1, 32>}, {pipeline_mode = #tpu.pipeline_mode<synchronous>, transform_indices = @transform_4, window_bounds = array<i64: 2, 32, 128>}, {pipeline_mode = #tpu.pipeline_mode<synchronous>, transform_indices = @transform_5, window_bounds = array<i64: 2, 1, 128>}, {pipeline_mode = #tpu.pipeline_mode<synchronous>, transform_indices = @transform_6, window_bounds = array<i64: 2, 32, 32>}, {pipeline_mode = #tpu.pipeline_mode<synchronous>, transform_indices = @transform_7, window_bounds = array<i64: 2, 1, 32>}, {pipeline_mode = #tpu.pipeline_mode<synchronous>, transform_indices = @transform_8, window_bounds = array<i64: 2, 1, 32>}, {pipeline_mode = #tpu.pipeline_mode<synchronous>, transform_indices = @transform_9, window_bounds = array<i64: 2, 1, 32>}, {pipeline_mode = #tpu.pipeline_mode<synchronous>, transform_indices = @transform_10, window_bounds = array<i64: 2, 32, 128>}, {pipeline_mode = #tpu.pipeline_mode<synchronous>, transform_indices = @transform_11, window_bounds = array<i64: 2, 1, 128>}, {pipeline_mode = #tpu.pipeline_mode<synchronous>, transform_indices = @transform_12, window_bounds = array<i64: 2, 128, 32>}, {pipeline_mode = #tpu.pipeline_mode<synchronous>, transform_indices = @transform_13, window_bounds = array<i64: 2, 1, 32>}, {pipeline_mode = #tpu.pipeline_mode<synchronous>, transform_indices = @transform_14, window_bounds = array<i64: 2, 1, 32>}, {pipeline_mode = #tpu.pipeline_mode<synchronous>, transform_indices = @transform_15, window_bounds = array<i64: 2, 1, 32>}, {pipeline_mode = #tpu.pipeline_mode<synchronous>, transform_indices = @transform_16, window_bounds = array<i64: 32, 32>}, {pipeline_mode = #tpu.pipeline_mode<synchronous>, transform_indices = @transform_17, window_bounds = array<i64: 1, 32>}, {pipeline_mode = #tpu.pipeline_mode<synchronous>, transform_indices = @transform_18, window_bounds = array<i64: 32, 128>}, {pipeline_mode = #tpu.pipeline_mode<synchronous>, transform_indices = @transform_19, window_bounds = array<i64: 1, 128>}, {pipeline_mode = #tpu.pipeline_mode<synchronous>, transform_indices = @transform_20, window_bounds = array<i64: 2, 128>}]} {
    %c0 = arith.constant 0 : index
    %c0_0 = arith.constant 0 : index
    %0 = vector.load %arg1[%c0, %c0_0] : memref<16x32xf32, #tpu.memory_space<vmem>>, vector<16x32xf32>
    %c0_1 = arith.constant 0 : index
    %c0_2 = arith.constant 0 : index
    %1 = vector.load %arg3[%c0_1, %c0_2] : memref<1x32xf32, #tpu.memory_space<vmem>>, vector<1x32xf32>
    %c0_3 = arith.constant 0 : index
    %c0_4 = arith.constant 0 : index
    %2 = vector.load %arg4[%c0_3, %c0_4] : memref<1x32xf32, #tpu.memory_space<vmem>>, vector<1x32xf32>
    %cst = arith.constant dense<0.000000e+00> : vector<16xf32>
    %3 = vector.multi_reduction <add>, %0, %cst [1] : vector<16x32xf32> to vector<16xf32>
    %4 = vector.shape_cast %3 : vector<16xf32> to vector<16x1xf32>
    %cst_5 = arith.constant 3.200000e+01 : f32
    %5 = vector.broadcast %cst_5 : f32 to vector<16x1xf32>
    %6 = arith.divf %4, %5 : vector<16x1xf32>
    %7 = arith.mulf %0, %0 : vector<16x32xf32>
    %cst_6 = arith.constant dense<0.000000e+00> : vector<16xf32>
    %8 = vector.multi_reduction <add>, %7, %cst_6 [1] : vector<16x32xf32> to vector<16xf32>
    %9 = vector.shape_cast %8 : vector<16xf32> to vector<16x1xf32>
    %cst_7 = arith.constant 3.200000e+01 : f32
    %10 = vector.broadcast %cst_7 : f32 to vector<16x1xf32>
    %11 = arith.divf %9, %10 : vector<16x1xf32>
    %12 = arith.mulf %6, %6 : vector<16x1xf32>
    %13 = arith.subf %11, %12 : vector<16x1xf32>
    %14 = vector.broadcast %6 : vector<16x1xf32> to vector<16x32xf32>
    %15 = arith.subf %0, %14 : vector<16x32xf32>
    %cst_8 = arith.constant 9.99999996E-13 : f32
    %16 = vector.broadcast %cst_8 : f32 to vector<16x1xf32>
    %17 = arith.addf %13, %16 : vector<16x1xf32>
    %18 = math.rsqrt %17 : vector<16x1xf32>
    %19 = vector.broadcast %18 : vector<16x1xf32> to vector<16x32xf32>
    %20 = arith.mulf %15, %19 : vector<16x32xf32>
    %21 = vector.broadcast %1 : vector<1x32xf32> to vector<16x32xf32>
    %22 = arith.mulf %20, %21 : vector<16x32xf32>
    %23 = vector.broadcast %2 : vector<1x32xf32> to vector<16x32xf32>
    %24 = arith.addf %22, %23 : vector<16x32xf32>
    %25 = arith.truncf %24 : vector<16x32xf32> to vector<16x32xbf16>
    %c0_9 = arith.constant 0 : index
    %c0_10 = arith.constant 0 : index
    %c0_11 = arith.constant 0 : index
    %26 = vector.load %arg5[%c0_9, %c0_10, %c0_11] : memref<2x32x128xbf16, #tpu.memory_space<vmem>>, vector<1x32x128xbf16>
    %27 = vector.shape_cast %26 : vector<1x32x128xbf16> to vector<32x128xbf16>
    %cst_12 = arith.constant dense<0.000000e+00> : vector<16x128xf32>
    %28 = tpu.matmul %25, %27, %cst_12 {dimension_numbers = #tpu.dot_dimension_numbers<[1], [0], [0], [1], [0, 0, 1, 1], [], []>} : vector<16x32xbf16>, vector<32x128xbf16>, vector<16x128xf32> -> vector<16x128xf32>
    %c0_13 = arith.constant 0 : index
    %c0_14 = arith.constant 0 : index
    %c0_15 = arith.constant 0 : index
    %29 = vector.load %arg6[%c0_13, %c0_14, %c0_15] : memref<2x1x128xf32, #tpu.memory_space<vmem>>, vector<1x1x128xf32>
    %30 = vector.shape_cast %29 : vector<1x1x128xf32> to vector<1x128xf32>
    %31 = vector.broadcast %30 : vector<1x128xf32> to vector<16x128xf32>
    %32 = arith.addf %28, %31 : vector<16x128xf32>
    %33 = vector.extract_strided_slice %32 {offsets = [0, 0], sizes = [16, 32], strides = [1, 1]} : vector<16x128xf32> to vector<16x32xf32>
    %cst_16 = arith.constant 2.500000e-01 : f32
    %34 = vector.broadcast %cst_16 : f32 to vector<16x32xf32>
    %35 = arith.mulf %33, %34 : vector<16x32xf32>
    %36 = arith.truncf %35 : vector<16x32xf32> to vector<16x32xbf16>
    %37 = vector.extract_strided_slice %32 {offsets = [0, 32], sizes = [16, 64], strides = [1, 1]} : vector<16x128xf32> to vector<16x64xf32>
    %38 = arith.truncf %37 : vector<16x64xf32> to vector<16x64xbf16>
    %39 = vector.extract_strided_slice %38 {offsets = [0, 0], sizes = [16, 32], strides = [1, 1]} : vector<16x64xbf16> to vector<16x32xbf16>
    %40 = vector.extract_strided_slice %38 {offsets = [0, 32], sizes = [16, 32], strides = [1, 1]} : vector<16x64xbf16> to vector<16x32xbf16>
    %c0_17 = arith.constant 0 : index
    %c0_18 = arith.constant 0 : index
    %c0_19 = arith.constant 0 : index
    %41 = vector.load %arg2[%c0_17, %c0_18, %c0_19] : memref<2x8x8xf32, #tpu.memory_space<vmem>>, vector<1x8x8xf32>
    %42 = vector.shape_cast %41 : vector<1x8x8xf32> to vector<8x8xf32>
    %43 = vector.extract_strided_slice %36 {offsets = [0, 0], sizes = [8, 16], strides = [1, 1]} : vector<16x32xbf16> to vector<8x16xbf16>
    %44 = vector.extract_strided_slice %39 {offsets = [0, 0], sizes = [8, 16], strides = [1, 1]} : vector<16x32xbf16> to vector<8x16xbf16>
    "tpu.trace_start"() <{level = 10 : i32, message = "qd,kd->qk"}> : () -> ()
    %cst_20 = arith.constant dense<0.000000e+00> : vector<8x8xf32>
    %45 = tpu.matmul %43, %44, %cst_20 {dimension_numbers = #tpu.dot_dimension_numbers<[1], [1], [0], [0], [0, 0, 1, 0], [], []>} : vector<8x16xbf16>, vector<8x16xbf16>, vector<8x8xf32> -> vector<8x8xf32>
    "tpu.trace_stop"() : () -> ()
    %46 = arith.addf %45, %42 : vector<8x8xf32>
    %cst_21 = arith.constant dense<0xFF800000> : vector<8xf32>
    %47 = vector.multi_reduction <maximumf>, %46, %cst_21 [1] : vector<8x8xf32> to vector<8xf32>
    %48 = vector.shape_cast %47 : vector<8xf32> to vector<8x1xf32>
    %49 = vector.broadcast %48 : vector<8x1xf32> to vector<8x8xf32>
    %50 = arith.subf %46, %49 : vector<8x8xf32>
    %51 = math.exp %50 : vector<8x8xf32>
    %cst_22 = arith.constant dense<0.000000e+00> : vector<8xf32>
    %52 = vector.multi_reduction <add>, %51, %cst_22 [1] : vector<8x8xf32> to vector<8xf32>
    %53 = vector.shape_cast %52 : vector<8xf32> to vector<8x1xf32>
    %54 = tpu.reciprocal %53 {approx = true} : vector<8x1xf32> -> vector<8x1xf32>
    %55 = vector.broadcast %54 : vector<8x1xf32> to vector<8x8xf32>
    %56 = arith.mulf %51, %55 : vector<8x8xf32>
    %57 = arith.truncf %56 : vector<8x8xf32> to vector<8x8xbf16>
    %58 = vector.extract_strided_slice %40 {offsets = [0, 0], sizes = [8, 16], strides = [1, 1]} : vector<16x32xbf16> to vector<8x16xbf16>
    %cst_23 = arith.constant dense<0.000000e+00> : vector<8x16xf32>
    %59 = tpu.matmul %57, %58, %cst_23 {dimension_numbers = #tpu.dot_dimension_numbers<[1], [0], [0], [1], [0, 0, 1, 1], [], []>} : vector<8x8xbf16>, vector<8x16xbf16>, vector<8x16xf32> -> vector<8x16xf32>
    %c0_24 = arith.constant 0 : index
    %c0_25 = arith.constant 0 : index
    %60 = vector.load %arg22[%c0_24, %c0_25] : memref<16x32xf32, #tpu.memory_space<vmem>>, vector<8x16xf32>
    tpu.vector_store %arg22[%c0_24, %c0_25], %59 {strides = array<i32>} : memref<16x32xf32, #tpu.memory_space<vmem>>, vector<8x16xf32>,
    %61 = vector.extract_strided_slice %36 {offsets = [0, 16], sizes = [8, 16], strides = [1, 1]} : vector<16x32xbf16> to vector<8x16xbf16>
    %62 = vector.extract_strided_slice %39 {offsets = [0, 16], sizes = [8, 16], strides = [1, 1]} : vector<16x32xbf16> to vector<8x16xbf16>
    "tpu.trace_start"() <{level = 10 : i32, message = "qd,kd->qk"}> : () -> ()
    %cst_26 = arith.constant dense<0.000000e+00> : vector<8x8xf32>
    %63 = tpu.matmul %61, %62, %cst_26 {dimension_numbers = #tpu.dot_dimension_numbers<[1], [1], [0], [0], [0, 0, 1, 0], [], []>} : vector<8x16xbf16>, vector<8x16xbf16>, vector<8x8xf32> -> vector<8x8xf32>
    "tpu.trace_stop"() : () -> ()
    %64 = arith.addf %63, %42 : vector<8x8xf32>
    %cst_27 = arith.constant dense<0xFF800000> : vector<8xf32>
    %65 = vector.multi_reduction <maximumf>, %64, %cst_27 [1] : vector<8x8xf32> to vector<8xf32>
    %66 = vector.shape_cast %65 : vector<8xf32> to vector<8x1xf32>
    %67 = vector.broadcast %66 : vector<8x1xf32> to vector<8x8xf32>
    %68 = arith.subf %64, %67 : vector<8x8xf32>
    %69 = math.exp %68 : vector<8x8xf32>
    %cst_28 = arith.constant dense<0.000000e+00> : vector<8xf32>
    %70 = vector.multi_reduction <add>, %69, %cst_28 [1] : vector<8x8xf32> to vector<8xf32>
    %71 = vector.shape_cast %70 : vector<8xf32> to vector<8x1xf32>
    %72 = tpu.reciprocal %71 {approx = true} : vector<8x1xf32> -> vector<8x1xf32>
    %73 = vector.broadcast %72 : vector<8x1xf32> to vector<8x8xf32>
    %74 = arith.mulf %69, %73 : vector<8x8xf32>
    %75 = arith.truncf %74 : vector<8x8xf32> to vector<8x8xbf16>
    %76 = vector.extract_strided_slice %40 {offsets = [0, 16], sizes = [8, 16], strides = [1, 1]} : vector<16x32xbf16> to vector<8x16xbf16>
    %cst_29 = arith.constant dense<0.000000e+00> : vector<8x16xf32>
    %77 = tpu.matmul %75, %76, %cst_29 {dimension_numbers = #tpu.dot_dimension_numbers<[1], [0], [0], [1], [0, 0, 1, 1], [], []>} : vector<8x8xbf16>, vector<8x16xbf16>, vector<8x16xf32> -> vector<8x16xf32>
    %c0_30 = arith.constant 0 : index
    %c16 = arith.constant 16 : index
    %78 = vector.load %arg22[%c0_30, %c16] : memref<16x32xf32, #tpu.memory_space<vmem>>, vector<8x16xf32>
    tpu.vector_store %arg22[%c0_30, %c16], %77 {strides = array<i32>} : memref<16x32xf32, #tpu.memory_space<vmem>>, vector<8x16xf32>,
    %c1 = arith.constant 1 : index
    %c0_31 = arith.constant 0 : index
    %c0_32 = arith.constant 0 : index
    %79 = vector.load %arg2[%c1, %c0_31, %c0_32] : memref<2x8x8xf32, #tpu.memory_space<vmem>>, vector<1x8x8xf32>
    %80 = vector.shape_cast %79 : vector<1x8x8xf32> to vector<8x8xf32>
    %81 = vector.extract_strided_slice %36 {offsets = [8, 0], sizes = [8, 16], strides = [1, 1]} : vector<16x32xbf16> to vector<8x16xbf16>
    %82 = vector.extract_strided_slice %39 {offsets = [8, 0], sizes = [8, 16], strides = [1, 1]} : vector<16x32xbf16> to vector<8x16xbf16>
    "tpu.trace_start"() <{level = 10 : i32, message = "qd,kd->qk"}> : () -> ()
    %cst_33 = arith.constant dense<0.000000e+00> : vector<8x8xf32>
    %83 = tpu.matmul %81, %82, %cst_33 {dimension_numbers = #tpu.dot_dimension_numbers<[1], [1], [0], [0], [0, 0, 1, 0], [], []>} : vector<8x16xbf16>, vector<8x16xbf16>, vector<8x8xf32> -> vector<8x8xf32>
    "tpu.trace_stop"() : () -> ()
    %84 = arith.addf %83, %80 : vector<8x8xf32>
    %cst_34 = arith.constant dense<0xFF800000> : vector<8xf32>
    %85 = vector.multi_reduction <maximumf>, %84, %cst_34 [1] : vector<8x8xf32> to vector<8xf32>
    %86 = vector.shape_cast %85 : vector<8xf32> to vector<8x1xf32>
    %87 = vector.broadcast %86 : vector<8x1xf32> to vector<8x8xf32>
    %88 = arith.subf %84, %87 : vector<8x8xf32>
    %89 = math.exp %88 : vector<8x8xf32>
    %cst_35 = arith.constant dense<0.000000e+00> : vector<8xf32>
    %90 = vector.multi_reduction <add>, %89, %cst_35 [1] : vector<8x8xf32> to vector<8xf32>
    %91 = vector.shape_cast %90 : vector<8xf32> to vector<8x1xf32>
    %92 = tpu.reciprocal %91 {approx = true} : vector<8x1xf32> -> vector<8x1xf32>
    %93 = vector.broadcast %92 : vector<8x1xf32> to vector<8x8xf32>
    %94 = arith.mulf %89, %93 : vector<8x8xf32>
    %95 = arith.truncf %94 : vector<8x8xf32> to vector<8x8xbf16>
    %96 = vector.extract_strided_slice %40 {offsets = [8, 0], sizes = [8, 16], strides = [1, 1]} : vector<16x32xbf16> to vector<8x16xbf16>
    %cst_36 = arith.constant dense<0.000000e+00> : vector<8x16xf32>
    %97 = tpu.matmul %95, %96, %cst_36 {dimension_numbers = #tpu.dot_dimension_numbers<[1], [0], [0], [1], [0, 0, 1, 1], [], []>} : vector<8x8xbf16>, vector<8x16xbf16>, vector<8x16xf32> -> vector<8x16xf32>
    %c8 = arith.constant 8 : index
    %c0_37 = arith.constant 0 : index
    %98 = vector.load %arg22[%c8, %c0_37] : memref<16x32xf32, #tpu.memory_space<vmem>>, vector<8x16xf32>
    tpu.vector_store %arg22[%c8, %c0_37], %97 {strides = array<i32>} : memref<16x32xf32, #tpu.memory_space<vmem>>, vector<8x16xf32>,
    %99 = vector.extract_strided_slice %36 {offsets = [8, 16], sizes = [8, 16], strides = [1, 1]} : vector<16x32xbf16> to vector<8x16xbf16>
    %100 = vector.extract_strided_slice %39 {offsets = [8, 16], sizes = [8, 16], strides = [1, 1]} : vector<16x32xbf16> to vector<8x16xbf16>
    "tpu.trace_start"() <{level = 10 : i32, message = "qd,kd->qk"}> : () -> ()
    %cst_38 = arith.constant dense<0.000000e+00> : vector<8x8xf32>
    %101 = tpu.matmul %99, %100, %cst_38 {dimension_numbers = #tpu.dot_dimension_numbers<[1], [1], [0], [0], [0, 0, 1, 0], [], []>} : vector<8x16xbf16>, vector<8x16xbf16>, vector<8x8xf32> -> vector<8x8xf32>
    "tpu.trace_stop"() : () -> ()
    %102 = arith.addf %101, %80 : vector<8x8xf32>
    %cst_39 = arith.constant dense<0xFF800000> : vector<8xf32>
    %103 = vector.multi_reduction <maximumf>, %102, %cst_39 [1] : vector<8x8xf32> to vector<8xf32>
    %104 = vector.shape_cast %103 : vector<8xf32> to vector<8x1xf32>
    %105 = vector.broadcast %104 : vector<8x1xf32> to vector<8x8xf32>
    %106 = arith.subf %102, %105 : vector<8x8xf32>
    %107 = math.exp %106 : vector<8x8xf32>
    %cst_40 = arith.constant dense<0.000000e+00> : vector<8xf32>
    %108 = vector.multi_reduction <add>, %107, %cst_40 [1] : vector<8x8xf32> to vector<8xf32>
    %109 = vector.shape_cast %108 : vector<8xf32> to vector<8x1xf32>
    %110 = tpu.reciprocal %109 {approx = true} : vector<8x1xf32> -> vector<8x1xf32>
    %111 = vector.broadcast %110 : vector<8x1xf32> to vector<8x8xf32>
    %112 = arith.mulf %107, %111 : vector<8x8xf32>
    %113 = arith.truncf %112 : vector<8x8xf32> to vector<8x8xbf16>
    %114 = vector.extract_strided_slice %40 {offsets = [8, 16], sizes = [8, 16], strides = [1, 1]} : vector<16x32xbf16> to vector<8x16xbf16>
    %cst_41 = arith.constant dense<0.000000e+00> : vector<8x16xf32>
    %115 = tpu.matmul %113, %114, %cst_41 {dimension_numbers = #tpu.dot_dimension_numbers<[1], [0], [0], [1], [0, 0, 1, 1], [], []>} : vector<8x8xbf16>, vector<8x16xbf16>, vector<8x16xf32> -> vector<8x16xf32>
    %c8_42 = arith.constant 8 : index
    %c16_43 = arith.constant 16 : index
    %116 = vector.load %arg22[%c8_42, %c16_43] : memref<16x32xf32, #tpu.memory_space<vmem>>, vector<8x16xf32>
    tpu.vector_store %arg22[%c8_42, %c16_43], %115 {strides = array<i32>} : memref<16x32xf32, #tpu.memory_space<vmem>>, vector<8x16xf32>,
    %c0_44 = arith.constant 0 : index
    %c0_45 = arith.constant 0 : index
    %117 = vector.load %arg22[%c0_44, %c0_45] : memref<16x32xf32, #tpu.memory_space<vmem>>, vector<16x32xf32>
    %118 = arith.truncf %117 : vector<16x32xf32> to vector<16x32xbf16>
    %c0_46 = arith.constant 0 : index
    %c0_47 = arith.constant 0 : index
    %c0_48 = arith.constant 0 : index
    %119 = vector.load %arg7[%c0_46, %c0_47, %c0_48] : memref<2x32x32xbf16, #tpu.memory_space<vmem>>, vector<1x32x32xbf16>
    %120 = vector.shape_cast %119 : vector<1x32x32xbf16> to vector<32x32xbf16>
    %cst_49 = arith.constant dense<0.000000e+00> : vector<16x32xf32>
    %121 = tpu.matmul %118, %120, %cst_49 {dimension_numbers = #tpu.dot_dimension_numbers<[1], [0], [0], [1], [0, 0, 1, 1], [], []>} : vector<16x32xbf16>, vector<32x32xbf16>, vector<16x32xf32> -> vector<16x32xf32>
    %c0_50 = arith.constant 0 : index
    %c0_51 = arith.constant 0 : index
    %c0_52 = arith.constant 0 : index
    %122 = vector.load %arg8[%c0_50, %c0_51, %c0_52] : memref<2x1x32xf32, #tpu.memory_space<vmem>>, vector<1x1x32xf32>
    %123 = vector.shape_cast %122 : vector<1x1x32xf32> to vector<1x32xf32>
    %124 = vector.broadcast %123 : vector<1x32xf32> to vector<16x32xf32>
    %125 = arith.addf %121, %124 : vector<16x32xf32>
    %126 = arith.addf %24, %125 : vector<16x32xf32>
    %c0_53 = arith.constant 0 : index
    %c0_54 = arith.constant 0 : index
    %c0_55 = arith.constant 0 : index
    %127 = vector.load %arg9[%c0_53, %c0_54, %c0_55] : memref<2x1x32xf32, #tpu.memory_space<vmem>>, vector<1x1x32xf32>
    %128 = vector.shape_cast %127 : vector<1x1x32xf32> to vector<1x32xf32>
    %c0_56 = arith.constant 0 : index
    %c0_57 = arith.constant 0 : index
    %c0_58 = arith.constant 0 : index
    %129 = vector.load %arg10[%c0_56, %c0_57, %c0_58] : memref<2x1x32xf32, #tpu.memory_space<vmem>>, vector<1x1x32xf32>
    %130 = vector.shape_cast %129 : vector<1x1x32xf32> to vector<1x32xf32>
    %cst_59 = arith.constant dense<0.000000e+00> : vector<16xf32>
    %131 = vector.multi_reduction <add>, %126, %cst_59 [1] : vector<16x32xf32> to vector<16xf32>
    %132 = vector.shape_cast %131 : vector<16xf32> to vector<16x1xf32>
    %cst_60 = arith.constant 3.200000e+01 : f32
    %133 = vector.broadcast %cst_60 : f32 to vector<16x1xf32>
    %134 = arith.divf %132, %133 : vector<16x1xf32>
    %135 = arith.mulf %126, %126 : vector<16x32xf32>
    %cst_61 = arith.constant dense<0.000000e+00> : vector<16xf32>
    %136 = vector.multi_reduction <add>, %135, %cst_61 [1] : vector<16x32xf32> to vector<16xf32>
    %137 = vector.shape_cast %136 : vector<16xf32> to vector<16x1xf32>
    %cst_62 = arith.constant 3.200000e+01 : f32
    %138 = vector.broadcast %cst_62 : f32 to vector<16x1xf32>
    %139 = arith.divf %137, %138 : vector<16x1xf32>
    %140 = arith.mulf %134, %134 : vector<16x1xf32>
    %141 = arith.subf %139, %140 : vector<16x1xf32>
    %142 = vector.broadcast %134 : vector<16x1xf32> to vector<16x32xf32>
    %143 = arith.subf %126, %142 : vector<16x32xf32>
    %cst_63 = arith.constant 9.99999996E-13 : f32
    %144 = vector.broadcast %cst_63 : f32 to vector<16x1xf32>
    %145 = arith.addf %141, %144 : vector<16x1xf32>
    %146 = math.rsqrt %145 : vector<16x1xf32>
    %147 = vector.broadcast %146 : vector<16x1xf32> to vector<16x32xf32>
    %148 = arith.mulf %143, %147 : vector<16x32xf32>
    %149 = vector.broadcast %128 : vector<1x32xf32> to vector<16x32xf32>
    %150 = arith.mulf %148, %149 : vector<16x32xf32>
    %151 = vector.broadcast %130 : vector<1x32xf32> to vector<16x32xf32>
    %152 = arith.addf %150, %151 : vector<16x32xf32>
    %153 = arith.truncf %152 : vector<16x32xf32> to vector<16x32xbf16>
    %c0_64 = arith.constant 0 : index
    %c0_65 = arith.constant 0 : index
    %c0_66 = arith.constant 0 : index
    %154 = vector.load %arg11[%c0_64, %c0_65, %c0_66] : memref<2x32x128xbf16, #tpu.memory_space<vmem>>, vector<1x32x128xbf16>
    %155 = vector.shape_cast %154 : vector<1x32x128xbf16> to vector<32x128xbf16>
    %cst_67 = arith.constant dense<0.000000e+00> : vector<16x128xf32>
    %156 = tpu.matmul %153, %155, %cst_67 {dimension_numbers = #tpu.dot_dimension_numbers<[1], [0], [0], [1], [0, 0, 1, 1], [], []>} : vector<16x32xbf16>, vector<32x128xbf16>, vector<16x128xf32> -> vector<16x128xf32>
    %c0_68 = arith.constant 0 : index
    %c0_69 = arith.constant 0 : index
    %c0_70 = arith.constant 0 : index
    %157 = vector.load %arg12[%c0_68, %c0_69, %c0_70] : memref<2x1x128xf32, #tpu.memory_space<vmem>>, vector<1x1x128xf32>
    %158 = vector.shape_cast %157 : vector<1x1x128xf32> to vector<1x128xf32>
    %159 = vector.broadcast %158 : vector<1x128xf32> to vector<16x128xf32>
    %160 = arith.addf %156, %159 : vector<16x128xf32>
    %161 = arith.mulf %160, %160 : vector<16x128xf32>
    %162 = arith.mulf %160, %161 : vector<16x128xf32>
    %cst_71 = arith.constant 4.471500e-02 : f32
    %163 = vector.broadcast %cst_71 : f32 to vector<16x128xf32>
    %164 = arith.mulf %163, %162 : vector<16x128xf32>
    %165 = arith.addf %160, %164 : vector<16x128xf32>
    %cst_72 = arith.constant 0.797884583 : f32
    %166 = vector.broadcast %cst_72 : f32 to vector<16x128xf32>
    %167 = arith.mulf %166, %165 : vector<16x128xf32>
    %168 = math.tanh %167 : vector<16x128xf32>
    %cst_73 = arith.constant 1.000000e+00 : f32
    %169 = vector.broadcast %cst_73 : f32 to vector<16x128xf32>
    %170 = arith.addf %169, %168 : vector<16x128xf32>
    %cst_74 = arith.constant 5.000000e-01 : f32
    %171 = vector.broadcast %cst_74 : f32 to vector<16x128xf32>
    %172 = arith.mulf %171, %170 : vector<16x128xf32>
    %173 = arith.mulf %160, %172 : vector<16x128xf32>
    %174 = arith.truncf %173 : vector<16x128xf32> to vector<16x128xbf16>
    %c0_75 = arith.constant 0 : index
    %c0_76 = arith.constant 0 : index
    %c0_77 = arith.constant 0 : index
    %175 = vector.load %arg13[%c0_75, %c0_76, %c0_77] : memref<2x128x32xbf16, #tpu.memory_space<vmem>>, vector<1x128x32xbf16>
    %176 = vector.shape_cast %175 : vector<1x128x32xbf16> to vector<128x32xbf16>
    %cst_78 = arith.constant dense<0.000000e+00> : vector<16x32xf32>
    %177 = tpu.matmul %174, %176, %cst_78 {dimension_numbers = #tpu.dot_dimension_numbers<[1], [0], [0], [1], [0, 0, 1, 1], [], []>} : vector<16x128xbf16>, vector<128x32xbf16>, vector<16x32xf32> -> vector<16x32xf32>
    %c0_79 = arith.constant 0 : index
    %c0_80 = arith.constant 0 : index
    %c0_81 = arith.constant 0 : index
    %178 = vector.load %arg14[%c0_79, %c0_80, %c0_81] : memref<2x1x32xf32, #tpu.memory_space<vmem>>, vector<1x1x32xf32>
    %179 = vector.shape_cast %178 : vector<1x1x32xf32> to vector<1x32xf32>
    %180 = vector.broadcast %179 : vector<1x32xf32> to vector<16x32xf32>
    %181 = arith.addf %177, %180 : vector<16x32xf32>
    %182 = arith.addf %152, %181 : vector<16x32xf32>
    %c0_82 = arith.constant 0 : index
    %c0_83 = arith.constant 0 : index
    %c0_84 = arith.constant 0 : index
    %183 = vector.load %arg15[%c0_82, %c0_83, %c0_84] : memref<2x1x32xf32, #tpu.memory_space<vmem>>, vector<1x1x32xf32>
    %184 = vector.shape_cast %183 : vector<1x1x32xf32> to vector<1x32xf32>
    %c0_85 = arith.constant 0 : index
    %c0_86 = arith.constant 0 : index
    %c0_87 = arith.constant 0 : index
    %185 = vector.load %arg16[%c0_85, %c0_86, %c0_87] : memref<2x1x32xf32, #tpu.memory_space<vmem>>, vector<1x1x32xf32>
    %186 = vector.shape_cast %185 : vector<1x1x32xf32> to vector<1x32xf32>
    %cst_88 = arith.constant dense<0.000000e+00> : vector<16xf32>
    %187 = vector.multi_reduction <add>, %182, %cst_88 [1] : vector<16x32xf32> to vector<16xf32>
    %188 = vector.shape_cast %187 : vector<16xf32> to vector<16x1xf32>
    %cst_89 = arith.constant 3.200000e+01 : f32
    %189 = vector.broadcast %cst_89 : f32 to vector<16x1xf32>
    %190 = arith.divf %188, %189 : vector<16x1xf32>
    %191 = arith.mulf %182, %182 : vector<16x32xf32>
    %cst_90 = arith.constant dense<0.000000e+00> : vector<16xf32>
    %192 = vector.multi_reduction <add>, %191, %cst_90 [1] : vector<16x32xf32> to vector<16xf32>
    %193 = vector.shape_cast %192 : vector<16xf32> to vector<16x1xf32>
    %cst_91 = arith.constant 3.200000e+01 : f32
    %194 = vector.broadcast %cst_91 : f32 to vector<16x1xf32>
    %195 = arith.divf %193, %194 : vector<16x1xf32>
    %196 = arith.mulf %190, %190 : vector<16x1xf32>
    %197 = arith.subf %195, %196 : vector<16x1xf32>
    %198 = vector.broadcast %190 : vector<16x1xf32> to vector<16x32xf32>
    %199 = arith.subf %182, %198 : vector<16x32xf32>
    %cst_92 = arith.constant 9.99999996E-13 : f32
    %200 = vector.broadcast %cst_92 : f32 to vector<16x1xf32>
    %201 = arith.addf %197, %200 : vector<16x1xf32>
    %202 = math.rsqrt %201 : vector<16x1xf32>
    %203 = vector.broadcast %202 : vector<16x1xf32> to vector<16x32xf32>
    %204 = arith.mulf %199, %203 : vector<16x32xf32>
    %205 = vector.broadcast %184 : vector<1x32xf32> to vector<16x32xf32>
    %206 = arith.mulf %204, %205 : vector<16x32xf32>
    %207 = vector.broadcast %186 : vector<1x32xf32> to vector<16x32xf32>
    %208 = arith.addf %206, %207 : vector<16x32xf32>
    %209 = arith.truncf %208 : vector<16x32xf32> to vector<16x32xbf16>
    %c1_93 = arith.constant 1 : index
    %c0_94 = arith.constant 0 : index
    %c0_95 = arith.constant 0 : index
    %210 = vector.load %arg5[%c1_93, %c0_94, %c0_95] : memref<2x32x128xbf16, #tpu.memory_space<vmem>>, vector<1x32x128xbf16>
    %211 = vector.shape_cast %210 : vector<1x32x128xbf16> to vector<32x128xbf16>
    %cst_96 = arith.constant dense<0.000000e+00> : vector<16x128xf32>
    %212 = tpu.matmul %209, %211, %cst_96 {dimension_numbers = #tpu.dot_dimension_numbers<[1], [0], [0], [1], [0, 0, 1, 1], [], []>} : vector<16x32xbf16>, vector<32x128xbf16>, vector<16x128xf32> -> vector<16x128xf32>
    %c1_97 = arith.constant 1 : index
    %c0_98 = arith.constant 0 : index
    %c0_99 = arith.constant 0 : index
    %213 = vector.load %arg6[%c1_97, %c0_98, %c0_99] : memref<2x1x128xf32, #tpu.memory_space<vmem>>, vector<1x1x128xf32>
    %214 = vector.shape_cast %213 : vector<1x1x128xf32> to vector<1x128xf32>
    %215 = vector.broadcast %214 : vector<1x128xf32> to vector<16x128xf32>
    %216 = arith.addf %212, %215 : vector<16x128xf32>
    %217 = vector.extract_strided_slice %216 {offsets = [0, 0], sizes = [16, 32], strides = [1, 1]} : vector<16x128xf32> to vector<16x32xf32>
    %cst_100 = arith.constant 2.500000e-01 : f32
    %218 = vector.broadcast %cst_100 : f32 to vector<16x32xf32>
    %219 = arith.mulf %217, %218 : vector<16x32xf32>
    %220 = arith.truncf %219 : vector<16x32xf32> to vector<16x32xbf16>
    %221 = vector.extract_strided_slice %216 {offsets = [0, 32], sizes = [16, 64], strides = [1, 1]} : vector<16x128xf32> to vector<16x64xf32>
    %222 = arith.truncf %221 : vector<16x64xf32> to vector<16x64xbf16>
    %223 = vector.extract_strided_slice %222 {offsets = [0, 0], sizes = [16, 32], strides = [1, 1]} : vector<16x64xbf16> to vector<16x32xbf16>
    %224 = vector.extract_strided_slice %222 {offsets = [0, 32], sizes = [16, 32], strides = [1, 1]} : vector<16x64xbf16> to vector<16x32xbf16>
    %c0_101 = arith.constant 0 : index
    %c0_102 = arith.constant 0 : index
    %c0_103 = arith.constant 0 : index
    %225 = vector.load %arg2[%c0_101, %c0_102, %c0_103] : memref<2x8x8xf32, #tpu.memory_space<vmem>>, vector<1x8x8xf32>
    %226 = vector.shape_cast %225 : vector<1x8x8xf32> to vector<8x8xf32>
    %227 = vector.extract_strided_slice %220 {offsets = [0, 0], sizes = [8, 16], strides = [1, 1]} : vector<16x32xbf16> to vector<8x16xbf16>
    %228 = vector.extract_strided_slice %223 {offsets = [0, 0], sizes = [8, 16], strides = [1, 1]} : vector<16x32xbf16> to vector<8x16xbf16>
    "tpu.trace_start"() <{level = 10 : i32, message = "qd,kd->qk"}> : () -> ()
    %cst_104 = arith.constant dense<0.000000e+00> : vector<8x8xf32>
    %229 = tpu.matmul %227, %228, %cst_104 {dimension_numbers = #tpu.dot_dimension_numbers<[1], [1], [0], [0], [0, 0, 1, 0], [], []>} : vector<8x16xbf16>, vector<8x16xbf16>, vector<8x8xf32> -> vector<8x8xf32>
    "tpu.trace_stop"() : () -> ()
    %230 = arith.addf %229, %226 : vector<8x8xf32>
    %cst_105 = arith.constant dense<0xFF800000> : vector<8xf32>
    %231 = vector.multi_reduction <maximumf>, %230, %cst_105 [1] : vector<8x8xf32> to vector<8xf32>
    %232 = vector.shape_cast %231 : vector<8xf32> to vector<8x1xf32>
    %233 = vector.broadcast %232 : vector<8x1xf32> to vector<8x8xf32>
    %234 = arith.subf %230, %233 : vector<8x8xf32>
    %235 = math.exp %234 : vector<8x8xf32>
    %cst_106 = arith.constant dense<0.000000e+00> : vector<8xf32>
    %236 = vector.multi_reduction <add>, %235, %cst_106 [1] : vector<8x8xf32> to vector<8xf32>
    %237 = vector.shape_cast %236 : vector<8xf32> to vector<8x1xf32>
    %238 = tpu.reciprocal %237 {approx = true} : vector<8x1xf32> -> vector<8x1xf32>
    %239 = vector.broadcast %238 : vector<8x1xf32> to vector<8x8xf32>
    %240 = arith.mulf %235, %239 : vector<8x8xf32>
    %241 = arith.truncf %240 : vector<8x8xf32> to vector<8x8xbf16>
    %242 = vector.extract_strided_slice %224 {offsets = [0, 0], sizes = [8, 16], strides = [1, 1]} : vector<16x32xbf16> to vector<8x16xbf16>
    %cst_107 = arith.constant dense<0.000000e+00> : vector<8x16xf32>
    %243 = tpu.matmul %241, %242, %cst_107 {dimension_numbers = #tpu.dot_dimension_numbers<[1], [0], [0], [1], [0, 0, 1, 1], [], []>} : vector<8x8xbf16>, vector<8x16xbf16>, vector<8x16xf32> -> vector<8x16xf32>
    %c0_108 = arith.constant 0 : index
    %c0_109 = arith.constant 0 : index
    %244 = vector.load %arg22[%c0_108, %c0_109] : memref<16x32xf32, #tpu.memory_space<vmem>>, vector<8x16xf32>
    tpu.vector_store %arg22[%c0_108, %c0_109], %243 {strides = array<i32>} : memref<16x32xf32, #tpu.memory_space<vmem>>, vector<8x16xf32>,
    %245 = vector.extract_strided_slice %220 {offsets = [0, 16], sizes = [8, 16], strides = [1, 1]} : vector<16x32xbf16> to vector<8x16xbf16>
    %246 = vector.extract_strided_slice %223 {offsets = [0, 16], sizes = [8, 16], strides = [1, 1]} : vector<16x32xbf16> to vector<8x16xbf16>
    "tpu.trace_start"() <{level = 10 : i32, message = "qd,kd->qk"}> : () -> ()
    %cst_110 = arith.constant dense<0.000000e+00> : vector<8x8xf32>
    %247 = tpu.matmul %245, %246, %cst_110 {dimension_numbers = #tpu.dot_dimension_numbers<[1], [1], [0], [0], [0, 0, 1, 0], [], []>} : vector<8x16xbf16>, vector<8x16xbf16>, vector<8x8xf32> -> vector<8x8xf32>
    "tpu.trace_stop"() : () -> ()
    %248 = arith.addf %247, %226 : vector<8x8xf32>
    %cst_111 = arith.constant dense<0xFF800000> : vector<8xf32>
    %249 = vector.multi_reduction <maximumf>, %248, %cst_111 [1] : vector<8x8xf32> to vector<8xf32>
    %250 = vector.shape_cast %249 : vector<8xf32> to vector<8x1xf32>
    %251 = vector.broadcast %250 : vector<8x1xf32> to vector<8x8xf32>
    %252 = arith.subf %248, %251 : vector<8x8xf32>
    %253 = math.exp %252 : vector<8x8xf32>
    %cst_112 = arith.constant dense<0.000000e+00> : vector<8xf32>
    %254 = vector.multi_reduction <add>, %253, %cst_112 [1] : vector<8x8xf32> to vector<8xf32>
    %255 = vector.shape_cast %254 : vector<8xf32> to vector<8x1xf32>
    %256 = tpu.reciprocal %255 {approx = true} : vector<8x1xf32> -> vector<8x1xf32>
    %257 = vector.broadcast %256 : vector<8x1xf32> to vector<8x8xf32>
    %258 = arith.mulf %253, %257 : vector<8x8xf32>
    %259 = arith.truncf %258 : vector<8x8xf32> to vector<8x8xbf16>
    %260 = vector.extract_strided_slice %224 {offsets = [0, 16], sizes = [8, 16], strides = [1, 1]} : vector<16x32xbf16> to vector<8x16xbf16>
    %cst_113 = arith.constant dense<0.000000e+00> : vector<8x16xf32>
    %261 = tpu.matmul %259, %260, %cst_113 {dimension_numbers = #tpu.dot_dimension_numbers<[1], [0], [0], [1], [0, 0, 1, 1], [], []>} : vector<8x8xbf16>, vector<8x16xbf16>, vector<8x16xf32> -> vector<8x16xf32>
    %c0_114 = arith.constant 0 : index
    %c16_115 = arith.constant 16 : index
    %262 = vector.load %arg22[%c0_114, %c16_115] : memref<16x32xf32, #tpu.memory_space<vmem>>, vector<8x16xf32>
    tpu.vector_store %arg22[%c0_114, %c16_115], %261 {strides = array<i32>} : memref<16x32xf32, #tpu.memory_space<vmem>>, vector<8x16xf32>,
    %c1_116 = arith.constant 1 : index
    %c0_117 = arith.constant 0 : index
    %c0_118 = arith.constant 0 : index
    %263 = vector.load %arg2[%c1_116, %c0_117, %c0_118] : memref<2x8x8xf32, #tpu.memory_space<vmem>>, vector<1x8x8xf32>
    %264 = vector.shape_cast %263 : vector<1x8x8xf32> to vector<8x8xf32>
    %265 = vector.extract_strided_slice %220 {offsets = [8, 0], sizes = [8, 16], strides = [1, 1]} : vector<16x32xbf16> to vector<8x16xbf16>
    %266 = vector.extract_strided_slice %223 {offsets = [8, 0], sizes = [8, 16], strides = [1, 1]} : vector<16x32xbf16> to vector<8x16xbf16>
    "tpu.trace_start"() <{level = 10 : i32, message = "qd,kd->qk"}> : () -> ()
    %cst_119 = arith.constant dense<0.000000e+00> : vector<8x8xf32>
    %267 = tpu.matmul %265, %266, %cst_119 {dimension_numbers = #tpu.dot_dimension_numbers<[1], [1], [0], [0], [0, 0, 1, 0], [], []>} : vector<8x16xbf16>, vector<8x16xbf16>, vector<8x8xf32> -> vector<8x8xf32>
    "tpu.trace_stop"() : () -> ()
    %268 = arith.addf %267, %264 : vector<8x8xf32>
    %cst_120 = arith.constant dense<0xFF800000> : vector<8xf32>
    %269 = vector.multi_reduction <maximumf>, %268, %cst_120 [1] : vector<8x8xf32> to vector<8xf32>
    %270 = vector.shape_cast %269 : vector<8xf32> to vector<8x1xf32>
    %271 = vector.broadcast %270 : vector<8x1xf32> to vector<8x8xf32>
    %272 = arith.subf %268, %271 : vector<8x8xf32>
    %273 = math.exp %272 : vector<8x8xf32>
    %cst_121 = arith.constant dense<0.000000e+00> : vector<8xf32>
    %274 = vector.multi_reduction <add>, %273, %cst_121 [1] : vector<8x8xf32> to vector<8xf32>
    %275 = vector.shape_cast %274 : vector<8xf32> to vector<8x1xf32>
    %276 = tpu.reciprocal %275 {approx = true} : vector<8x1xf32> -> vector<8x1xf32>
    %277 = vector.broadcast %276 : vector<8x1xf32> to vector<8x8xf32>
    %278 = arith.mulf %273, %277 : vector<8x8xf32>
    %279 = arith.truncf %278 : vector<8x8xf32> to vector<8x8xbf16>
    %280 = vector.extract_strided_slice %224 {offsets = [8, 0], sizes = [8, 16], strides = [1, 1]} : vector<16x32xbf16> to vector<8x16xbf16>
    %cst_122 = arith.constant dense<0.000000e+00> : vector<8x16xf32>
    %281 = tpu.matmul %279, %280, %cst_122 {dimension_numbers = #tpu.dot_dimension_numbers<[1], [0], [0], [1], [0, 0, 1, 1], [], []>} : vector<8x8xbf16>, vector<8x16xbf16>, vector<8x16xf32> -> vector<8x16xf32>
    %c8_123 = arith.constant 8 : index
    %c0_124 = arith.constant 0 : index
    %282 = vector.load %arg22[%c8_123, %c0_124] : memref<16x32xf32, #tpu.memory_space<vmem>>, vector<8x16xf32>
    tpu.vector_store %arg22[%c8_123, %c0_124], %281 {strides = array<i32>} : memref<16x32xf32, #tpu.memory_space<vmem>>, vector<8x16xf32>,
    %283 = vector.extract_strided_slice %220 {offsets = [8, 16], sizes = [8, 16], strides = [1, 1]} : vector<16x32xbf16> to vector<8x16xbf16>
    %284 = vector.extract_strided_slice %223 {offsets = [8, 16], sizes = [8, 16], strides = [1, 1]} : vector<16x32xbf16> to vector<8x16xbf16>
    "tpu.trace_start"() <{level = 10 : i32, message = "qd,kd->qk"}> : () -> ()
    %cst_125 = arith.constant dense<0.000000e+00> : vector<8x8xf32>
    %285 = tpu.matmul %283, %284, %cst_125 {dimension_numbers = #tpu.dot_dimension_numbers<[1], [1], [0], [0], [0, 0, 1, 0], [], []>} : vector<8x16xbf16>, vector<8x16xbf16>, vector<8x8xf32> -> vector<8x8xf32>
    "tpu.trace_stop"() : () -> ()
    %286 = arith.addf %285, %264 : vector<8x8xf32>
    %cst_126 = arith.constant dense<0xFF800000> : vector<8xf32>
    %287 = vector.multi_reduction <maximumf>, %286, %cst_126 [1] : vector<8x8xf32> to vector<8xf32>
    %288 = vector.shape_cast %287 : vector<8xf32> to vector<8x1xf32>
    %289 = vector.broadcast %288 : vector<8x1xf32> to vector<8x8xf32>
    %290 = arith.subf %286, %289 : vector<8x8xf32>
    %291 = math.exp %290 : vector<8x8xf32>
    %cst_127 = arith.constant dense<0.000000e+00> : vector<8xf32>
    %292 = vector.multi_reduction <add>, %291, %cst_127 [1] : vector<8x8xf32> to vector<8xf32>
    %293 = vector.shape_cast %292 : vector<8xf32> to vector<8x1xf32>
    %294 = tpu.reciprocal %293 {approx = true} : vector<8x1xf32> -> vector<8x1xf32>
    %295 = vector.broadcast %294 : vector<8x1xf32> to vector<8x8xf32>
    %296 = arith.mulf %291, %295 : vector<8x8xf32>
    %297 = arith.truncf %296 : vector<8x8xf32> to vector<8x8xbf16>
    %298 = vector.extract_strided_slice %224 {offsets = [8, 16], sizes = [8, 16], strides = [1, 1]} : vector<16x32xbf16> to vector<8x16xbf16>
    %cst_128 = arith.constant dense<0.000000e+00> : vector<8x16xf32>
    %299 = tpu.matmul %297, %298, %cst_128 {dimension_numbers = #tpu.dot_dimension_numbers<[1], [0], [0], [1], [0, 0, 1, 1], [], []>} : vector<8x8xbf16>, vector<8x16xbf16>, vector<8x16xf32> -> vector<8x16xf32>
    %c8_129 = arith.constant 8 : index
    %c16_130 = arith.constant 16 : index
    %300 = vector.load %arg22[%c8_129, %c16_130] : memref<16x32xf32, #tpu.memory_space<vmem>>, vector<8x16xf32>
    tpu.vector_store %arg22[%c8_129, %c16_130], %299 {strides = array<i32>} : memref<16x32xf32, #tpu.memory_space<vmem>>, vector<8x16xf32>,
    %c0_131 = arith.constant 0 : index
    %c0_132 = arith.constant 0 : index
    %301 = vector.load %arg22[%c0_131, %c0_132] : memref<16x32xf32, #tpu.memory_space<vmem>>, vector<16x32xf32>
    %302 = arith.truncf %301 : vector<16x32xf32> to vector<16x32xbf16>
    %c1_133 = arith.constant 1 : index
    %c0_134 = arith.constant 0 : index
    %c0_135 = arith.constant 0 : index
    %303 = vector.load %arg7[%c1_133, %c0_134, %c0_135] : memref<2x32x32xbf16, #tpu.memory_space<vmem>>, vector<1x32x32xbf16>
    %304 = vector.shape_cast %303 : vector<1x32x32xbf16> to vector<32x32xbf16>
    %cst_136 = arith.constant dense<0.000000e+00> : vector<16x32xf32>
    %305 = tpu.matmul %302, %304, %cst_136 {dimension_numbers = #tpu.dot_dimension_numbers<[1], [0], [0], [1], [0, 0, 1, 1], [], []>} : vector<16x32xbf16>, vector<32x32xbf16>, vector<16x32xf32> -> vector<16x32xf32>
    %c1_137 = arith.constant 1 : index
    %c0_138 = arith.constant 0 : index
    %c0_139 = arith.constant 0 : index
    %306 = vector.load %arg8[%c1_137, %c0_138, %c0_139] : memref<2x1x32xf32, #tpu.memory_space<vmem>>, vector<1x1x32xf32>
    %307 = vector.shape_cast %306 : vector<1x1x32xf32> to vector<1x32xf32>
    %308 = vector.broadcast %307 : vector<1x32xf32> to vector<16x32xf32>
    %309 = arith.addf %305, %308 : vector<16x32xf32>
    %310 = arith.addf %208, %309 : vector<16x32xf32>
    %c1_140 = arith.constant 1 : index
    %c0_141 = arith.constant 0 : index
    %c0_142 = arith.constant 0 : index
    %311 = vector.load %arg9[%c1_140, %c0_141, %c0_142] : memref<2x1x32xf32, #tpu.memory_space<vmem>>, vector<1x1x32xf32>
    %312 = vector.shape_cast %311 : vector<1x1x32xf32> to vector<1x32xf32>
    %c1_143 = arith.constant 1 : index
    %c0_144 = arith.constant 0 : index
    %c0_145 = arith.constant 0 : index
    %313 = vector.load %arg10[%c1_143, %c0_144, %c0_145] : memref<2x1x32xf32, #tpu.memory_space<vmem>>, vector<1x1x32xf32>
    %314 = vector.shape_cast %313 : vector<1x1x32xf32> to vector<1x32xf32>
    %cst_146 = arith.constant dense<0.000000e+00> : vector<16xf32>
    %315 = vector.multi_reduction <add>, %310, %cst_146 [1] : vector<16x32xf32> to vector<16xf32>
    %316 = vector.shape_cast %315 : vector<16xf32> to vector<16x1xf32>
    %cst_147 = arith.constant 3.200000e+01 : f32
    %317 = vector.broadcast %cst_147 : f32 to vector<16x1xf32>
    %318 = arith.divf %316, %317 : vector<16x1xf32>
    %319 = arith.mulf %310, %310 : vector<16x32xf32>
    %cst_148 = arith.constant dense<0.000000e+00> : vector<16xf32>
    %320 = vector.multi_reduction <add>, %319, %cst_148 [1] : vector<16x32xf32> to vector<16xf32>
    %321 = vector.shape_cast %320 : vector<16xf32> to vector<16x1xf32>
    %cst_149 = arith.constant 3.200000e+01 : f32
    %322 = vector.broadcast %cst_149 : f32 to vector<16x1xf32>
    %323 = arith.divf %321, %322 : vector<16x1xf32>
    %324 = arith.mulf %318, %318 : vector<16x1xf32>
    %325 = arith.subf %323, %324 : vector<16x1xf32>
    %326 = vector.broadcast %318 : vector<16x1xf32> to vector<16x32xf32>
    %327 = arith.subf %310, %326 : vector<16x32xf32>
    %cst_150 = arith.constant 9.99999996E-13 : f32
    %328 = vector.broadcast %cst_150 : f32 to vector<16x1xf32>
    %329 = arith.addf %325, %328 : vector<16x1xf32>
    %330 = math.rsqrt %329 : vector<16x1xf32>
    %331 = vector.broadcast %330 : vector<16x1xf32> to vector<16x32xf32>
    %332 = arith.mulf %327, %331 : vector<16x32xf32>
    %333 = vector.broadcast %312 : vector<1x32xf32> to vector<16x32xf32>
    %334 = arith.mulf %332, %333 : vector<16x32xf32>
    %335 = vector.broadcast %314 : vector<1x32xf32> to vector<16x32xf32>
    %336 = arith.addf %334, %335 : vector<16x32xf32>
    %337 = arith.truncf %336 : vector<16x32xf32> to vector<16x32xbf16>
    %c1_151 = arith.constant 1 : index
    %c0_152 = arith.constant 0 : index
    %c0_153 = arith.constant 0 : index
    %338 = vector.load %arg11[%c1_151, %c0_152, %c0_153] : memref<2x32x128xbf16, #tpu.memory_space<vmem>>, vector<1x32x128xbf16>
    %339 = vector.shape_cast %338 : vector<1x32x128xbf16> to vector<32x128xbf16>
    %cst_154 = arith.constant dense<0.000000e+00> : vector<16x128xf32>
    %340 = tpu.matmul %337, %339, %cst_154 {dimension_numbers = #tpu.dot_dimension_numbers<[1], [0], [0], [1], [0, 0, 1, 1], [], []>} : vector<16x32xbf16>, vector<32x128xbf16>, vector<16x128xf32> -> vector<16x128xf32>
    %c1_155 = arith.constant 1 : index
    %c0_156 = arith.constant 0 : index
    %c0_157 = arith.constant 0 : index
    %341 = vector.load %arg12[%c1_155, %c0_156, %c0_157] : memref<2x1x128xf32, #tpu.memory_space<vmem>>, vector<1x1x128xf32>
    %342 = vector.shape_cast %341 : vector<1x1x128xf32> to vector<1x128xf32>
    %343 = vector.broadcast %342 : vector<1x128xf32> to vector<16x128xf32>
    %344 = arith.addf %340, %343 : vector<16x128xf32>
    %345 = arith.mulf %344, %344 : vector<16x128xf32>
    %346 = arith.mulf %344, %345 : vector<16x128xf32>
    %cst_158 = arith.constant 4.471500e-02 : f32
    %347 = vector.broadcast %cst_158 : f32 to vector<16x128xf32>
    %348 = arith.mulf %347, %346 : vector<16x128xf32>
    %349 = arith.addf %344, %348 : vector<16x128xf32>
    %cst_159 = arith.constant 0.797884583 : f32
    %350 = vector.broadcast %cst_159 : f32 to vector<16x128xf32>
    %351 = arith.mulf %350, %349 : vector<16x128xf32>
    %352 = math.tanh %351 : vector<16x128xf32>
    %cst_160 = arith.constant 1.000000e+00 : f32
    %353 = vector.broadcast %cst_160 : f32 to vector<16x128xf32>
    %354 = arith.addf %353, %352 : vector<16x128xf32>
    %cst_161 = arith.constant 5.000000e-01 : f32
    %355 = vector.broadcast %cst_161 : f32 to vector<16x128xf32>
    %356 = arith.mulf %355, %354 : vector<16x128xf32>
    %357 = arith.mulf %344, %356 : vector<16x128xf32>
    %358 = arith.truncf %357 : vector<16x128xf32> to vector<16x128xbf16>
    %c1_162 = arith.constant 1 : index
    %c0_163 = arith.constant 0 : index
    %c0_164 = arith.constant 0 : index
    %359 = vector.load %arg13[%c1_162, %c0_163, %c0_164] : memref<2x128x32xbf16, #tpu.memory_space<vmem>>, vector<1x128x32xbf16>
    %360 = vector.shape_cast %359 : vector<1x128x32xbf16> to vector<128x32xbf16>
    %cst_165 = arith.constant dense<0.000000e+00> : vector<16x32xf32>
    %361 = tpu.matmul %358, %360, %cst_165 {dimension_numbers = #tpu.dot_dimension_numbers<[1], [0], [0], [1], [0, 0, 1, 1], [], []>} : vector<16x128xbf16>, vector<128x32xbf16>, vector<16x32xf32> -> vector<16x32xf32>
    %c1_166 = arith.constant 1 : index
    %c0_167 = arith.constant 0 : index
    %c0_168 = arith.constant 0 : index
    %362 = vector.load %arg14[%c1_166, %c0_167, %c0_168] : memref<2x1x32xf32, #tpu.memory_space<vmem>>, vector<1x1x32xf32>
    %363 = vector.shape_cast %362 : vector<1x1x32xf32> to vector<1x32xf32>
    %364 = vector.broadcast %363 : vector<1x32xf32> to vector<16x32xf32>
    %365 = arith.addf %361, %364 : vector<16x32xf32>
    %366 = arith.addf %336, %365 : vector<16x32xf32>
    %c1_169 = arith.constant 1 : index
    %c0_170 = arith.constant 0 : index
    %c0_171 = arith.constant 0 : index
    %367 = vector.load %arg15[%c1_169, %c0_170, %c0_171] : memref<2x1x32xf32, #tpu.memory_space<vmem>>, vector<1x1x32xf32>
    %368 = vector.shape_cast %367 : vector<1x1x32xf32> to vector<1x32xf32>
    %c1_172 = arith.constant 1 : index
    %c0_173 = arith.constant 0 : index
    %c0_174 = arith.constant 0 : index
    %369 = vector.load %arg16[%c1_172, %c0_173, %c0_174] : memref<2x1x32xf32, #tpu.memory_space<vmem>>, vector<1x1x32xf32>
    %370 = vector.shape_cast %369 : vector<1x1x32xf32> to vector<1x32xf32>
    %cst_175 = arith.constant dense<0.000000e+00> : vector<16xf32>
    %371 = vector.multi_reduction <add>, %366, %cst_175 [1] : vector<16x32xf32> to vector<16xf32>
    %372 = vector.shape_cast %371 : vector<16xf32> to vector<16x1xf32>
    %cst_176 = arith.constant 3.200000e+01 : f32
    %373 = vector.broadcast %cst_176 : f32 to vector<16x1xf32>
    %374 = arith.divf %372, %373 : vector<16x1xf32>
    %375 = arith.mulf %366, %366 : vector<16x32xf32>
    %cst_177 = arith.constant dense<0.000000e+00> : vector<16xf32>
    %376 = vector.multi_reduction <add>, %375, %cst_177 [1] : vector<16x32xf32> to vector<16xf32>
    %377 = vector.shape_cast %376 : vector<16xf32> to vector<16x1xf32>
    %cst_178 = arith.constant 3.200000e+01 : f32
    %378 = vector.broadcast %cst_178 : f32 to vector<16x1xf32>
    %379 = arith.divf %377, %378 : vector<16x1xf32>
    %380 = arith.mulf %374, %374 : vector<16x1xf32>
    %381 = arith.subf %379, %380 : vector<16x1xf32>
    %382 = vector.broadcast %374 : vector<16x1xf32> to vector<16x32xf32>
    %383 = arith.subf %366, %382 : vector<16x32xf32>
    %cst_179 = arith.constant 9.99999996E-13 : f32
    %384 = vector.broadcast %cst_179 : f32 to vector<16x1xf32>
    %385 = arith.addf %381, %384 : vector<16x1xf32>
    %386 = math.rsqrt %385 : vector<16x1xf32>
    %387 = vector.broadcast %386 : vector<16x1xf32> to vector<16x32xf32>
    %388 = arith.mulf %383, %387 : vector<16x32xf32>
    %389 = vector.broadcast %368 : vector<1x32xf32> to vector<16x32xf32>
    %390 = arith.mulf %388, %389 : vector<16x32xf32>
    %391 = vector.broadcast %370 : vector<1x32xf32> to vector<16x32xf32>
    %392 = arith.addf %390, %391 : vector<16x32xf32>
    %393 = vector.extract_strided_slice %392 {offsets = [0, 0], sizes = [1, 32], strides = [1, 1]} : vector<16x32xf32> to vector<1x32xf32>
    %394 = vector.extract_strided_slice %392 {offsets = [8, 0], sizes = [1, 32], strides = [1, 1]} : vector<16x32xf32> to vector<1x32xf32>
    %395 = tpu.concatenate %393, %394 in 0 : vector<1x32xf32>, vector<1x32xf32> -> vector<2x32xf32>
    %396 = arith.truncf %395 : vector<2x32xf32> to vector<2x32xbf16>
    %c0_180 = arith.constant 0 : index
    %c0_181 = arith.constant 0 : index
    %397 = vector.load %arg17[%c0_180, %c0_181] : memref<32x32xbf16, #tpu.memory_space<vmem>>, vector<32x32xbf16>
    %cst_182 = arith.constant dense<0.000000e+00> : vector<2x32xf32>
    %398 = tpu.matmul %396, %397, %cst_182 {dimension_numbers = #tpu.dot_dimension_numbers<[1], [0], [0], [1], [0, 0, 1, 1], [], []>} : vector<2x32xbf16>, vector<32x32xbf16>, vector<2x32xf32> -> vector<2x32xf32>
    %c0_183 = arith.constant 0 : index
    %c0_184 = arith.constant 0 : index
    %399 = vector.load %arg18[%c0_183, %c0_184] : memref<1x32xf32, #tpu.memory_space<vmem>>, vector<1x32xf32>
    %400 = vector.broadcast %399 : vector<1x32xf32> to vector<2x32xf32>
    %401 = arith.addf %398, %400 : vector<2x32xf32>
    %402 = math.tanh %401 : vector<2x32xf32>
    %cst_185 = arith.constant 0.000000e+00 : f32
    %403 = vector.broadcast %cst_185 : f32 to vector<2x32xf32>
    %404 = arith.maximumf %402, %403 : vector<2x32xf32>
    %405 = arith.truncf %404 : vector<2x32xf32> to vector<2x32xbf16>
    %c0_186 = arith.constant 0 : index
    %c0_187 = arith.constant 0 : index
    %406 = vector.load %arg19[%c0_186, %c0_187] : memref<32x128xbf16, #tpu.memory_space<vmem>>, vector<32x128xbf16>
    %cst_188 = arith.constant dense<0.000000e+00> : vector<2x128xf32>
    %407 = tpu.matmul %405, %406, %cst_188 {dimension_numbers = #tpu.dot_dimension_numbers<[1], [0], [0], [1], [0, 0, 1, 1], [], []>} : vector<2x32xbf16>, vector<32x128xbf16>, vector<2x128xf32> -> vector<2x128xf32>
    %c0_189 = arith.constant 0 : index
    %c0_190 = arith.constant 0 : index
    %408 = vector.load %arg20[%c0_189, %c0_190] : memref<1x128xf32, #tpu.memory_space<vmem>>, vector<1x128xf32>
    %409 = vector.broadcast %408 : vector<1x128xf32> to vector<2x128xf32>
    %410 = arith.addf %407, %409 : vector<2x128xf32>
    %c0_191 = arith.constant 0 : index
    %c0_192 = arith.constant 0 : index
    %411 = vector.load %arg21[%c0_191, %c0_192] : memref<2x128xf32, #tpu.memory_space<vmem>>, vector<2x128xf32>
    tpu.vector_store %arg21[%c0_191, %c0_192], %410 {strides = array<i32>} : memref<2x128xf32, #tpu.memory_space<vmem>>, vector<2x128xf32>,
    return
  }
  func.func @transform_0(%arg0: i32) -> (i32, i32) {
    %c0_i32 = arith.constant 0 : i32
    %c0_i32_0 = arith.constant 0 : i32
    %c0_i32_1 = arith.constant 0 : i32
    return %c0_i32, %c0_i32_0 : i32, i32
  }
  func.func @transform_1(%arg0: i32) -> (i32, i32, i32) {
    %c0_i32 = arith.constant 0 : i32
    %c0_i32_0 = arith.constant 0 : i32
    %c0_i32_1 = arith.constant 0 : i32
    %c0_i32_2 = arith.constant 0 : i32
    return %c0_i32, %c0_i32_0, %c0_i32_1 : i32, i32, i32
  }
  func.func @transform_2(%arg0: i32) -> (i32, i32) {
    %c0_i32 = arith.constant 0 : i32
    %c0_i32_0 = arith.constant 0 : i32
    %c0_i32_1 = arith.constant 0 : i32
    return %c0_i32, %c0_i32_0 : i32, i32
  }
  func.func @transform_3(%arg0: i32) -> (i32, i32) {
    %c0_i32 = arith.constant 0 : i32
    %c0_i32_0 = arith.constant 0 : i32
    %c0_i32_1 = arith.constant 0 : i32
    return %c0_i32, %c0_i32_0 : i32, i32
  }
  func.func @transform_4(%arg0: i32) -> (i32, i32, i32) {
    %c0_i32 = arith.constant 0 : i32
    %c0_i32_0 = arith.constant 0 : i32
    %c0_i32_1 = arith.constant 0 : i32
    %c0_i32_2 = arith.constant 0 : i32
    return %c0_i32, %c0_i32_0, %c0_i32_1 : i32, i32, i32
  }
  func.func @transform_5(%arg0: i32) -> (i32, i32, i32) {
    %c0_i32 = arith.constant 0 : i32
    %c0_i32_0 = arith.constant 0 : i32
    %c0_i32_1 = arith.constant 0 : i32
    %c0_i32_2 = arith.constant 0 : i32
    return %c0_i32, %c0_i32_0, %c0_i32_1 : i32, i32, i32
  }
  func.func @transform_6(%arg0: i32) -> (i32, i32, i32) {
    %c0_i32 = arith.constant 0 : i32
    %c0_i32_0 = arith.constant 0 : i32
    %c0_i32_1 = arith.constant 0 : i32
    %c0_i32_2 = arith.constant 0 : i32
    return %c0_i32, %c0_i32_0, %c0_i32_1 : i32, i32, i32
  }
  func.func @transform_7(%arg0: i32) -> (i32, i32, i32) {
    %c0_i32 = arith.constant 0 : i32
    %c0_i32_0 = arith.constant 0 : i32
    %c0_i32_1 = arith.constant 0 : i32
    %c0_i32_2 = arith.constant 0 : i32
    return %c0_i32, %c0_i32_0, %c0_i32_1 : i32, i32, i32
  }
  func.func @transform_8(%arg0: i32) -> (i32, i32, i32) {
    %c0_i32 = arith.constant 0 : i32
    %c0_i32_0 = arith.constant 0 : i32
    %c0_i32_1 = arith.constant 0 : i32
    %c0_i32_2 = arith.constant 0 : i32
    return %c0_i32, %c0_i32_0, %c0_i32_1 : i32, i32, i32
  }
  func.func @transform_9(%arg0: i32) -> (i32, i32, i32) {
    %c0_i32 = arith.constant 0 : i32
    %c0_i32_0 = arith.constant 0 : i32
    %c0_i32_1 = arith.constant 0 : i32
    %c0_i32_2 = arith.constant 0 : i32
    return %c0_i32, %c0_i32_0, %c0_i32_1 : i32, i32, i32
  }
  func.func @transform_10(%arg0: i32) -> (i32, i32, i32) {
    %c0_i32 = arith.constant 0 : i32
    %c0_i32_0 = arith.constant 0 : i32
    %c0_i32_1 = arith.constant 0 : i32
    %c0_i32_2 = arith.constant 0 : i32
    return %c0_i32, %c0_i32_0, %c0_i32_1 : i32, i32, i32
  }
  func.func @transform_11(%arg0: i32) -> (i32, i32, i32) {
    %c0_i32 = arith.constant 0 : i32
    %c0_i32_0 = arith.constant 0 : i32
    %c0_i32_1 = arith.constant 0 : i32
    %c0_i32_2 = arith.constant 0 : i32
    return %c0_i32, %c0_i32_0, %c0_i32_1 : i32, i32, i32
  }
  func.func @transform_12(%arg0: i32) -> (i32, i32, i32) {
    %c0_i32 = arith.constant 0 : i32
    %c0_i32_0 = arith.constant 0 : i32
    %c0_i32_1 = arith.constant 0 : i32
    %c0_i32_2 = arith.constant 0 : i32
    return %c0_i32, %c0_i32_0, %c0_i32_1 : i32, i32, i32
  }
  func.func @transform_13(%arg0: i32) -> (i32, i32, i32) {
    %c0_i32 = arith.constant 0 : i32
    %c0_i32_0 = arith.constant 0 : i32
    %c0_i32_1 = arith.constant 0 : i32
    %c0_i32_2 = arith.constant 0 : i32
    return %c0_i32, %c0_i32_0, %c0_i32_1 : i32, i32, i32
  }
  func.func @transform_14(%arg0: i32) -> (i32, i32, i32) {
    %c0_i32 = arith.constant 0 : i32
    %c0_i32_0 = arith.constant 0 : i32
    %c0_i32_1 = arith.constant 0 : i32
    %c0_i32_2 = arith.constant 0 : i32
    return %c0_i32, %c0_i32_0, %c0_i32_1 : i32, i32, i32
  }
  func.func @transform_15(%arg0: i32) -> (i32, i32, i32) {
    %c0_i32 = arith.constant 0 : i32
    %c0_i32_0 = arith.constant 0 : i32
    %c0_i32_1 = arith.constant 0 : i32
    %c0_i32_2 = arith.constant 0 : i32
    return %c0_i32, %c0_i32_0, %c0_i32_1 : i32, i32, i32
  }
  func.func @transform_16(%arg0: i32) -> (i32, i32) {
    %c0_i32 = arith.constant 0 : i32
    %c0_i32_0 = arith.constant 0 : i32
    %c0_i32_1 = arith.constant 0 : i32
    return %c0_i32, %c0_i32_0 : i32, i32
  }
  func.func @transform_17(%arg0: i32) -> (i32, i32) {
    %c0_i32 = arith.constant 0 : i32
    %c0_i32_0 = arith.constant 0 : i32
    %c0_i32_1 = arith.constant 0 : i32
    return %c0_i32, %c0_i32_0 : i32, i32
  }
  func.func @transform_18(%arg0: i32) -> (i32, i32) {
    %c0_i32 = arith.constant 0 : i32
    %c0_i32_0 = arith.constant 0 : i32
    %c0_i32_1 = arith.constant 0 : i32
    return %c0_i32, %c0_i32_0 : i32, i32
  }
  func.func @transform_19(%arg0: i32) -> (i32, i32) {
    %c0_i32 = arith.constant 0 : i32
    %c0_i32_0 = arith.constant 0 : i32
    %c0_i32_1 = arith.constant 0 : i32
    return %c0_i32, %c0_i32_0 : i32, i32
  }
  func.func @transform_20(%arg0: i32) -> (i32, i32) {
    %c0_i32 = arith.constant 0 : i32
    %c0_i32_0 = arith.constant 0 : i32
    %c0_i32_1 = arith.constant 0 : i32
    return %c0_i32, %c0_i32_0 : i32, i32
  }
}

</mosaic_0001>

<bundles_post_ra>
// kernel: emotion_classifier_forward.1
= control target key start
LH: loop header
LB: loop body
LE: loop exit
PB: predicated region body
PF: predicated region fallthrough
CT: control target
= control target key end

     0   :  { %s2250_s0 = inlined_call_operand.vmem [shape: f32[16,32], index: 0, kind: input, shape index: {}]   ;;  %s2251_s1 = inlined_call_operand.vmem [shape: f32[2,8,8], index: 1, kind: input, shape index: {}]   ;;  %s2252_s2 = inlined_call_operand.vmem [shape: f32[1,32], index: 2, kind: input, shape index: {}]   ;;  %s2253_s3 = inlined_call_operand.vmem [shape: f32[1,32], index: 3, kind: input, shape index: {}]   ;;  %s2254_s4 = inlined_call_operand.vmem [shape: bf16[2,32,128], index: 4, kind: input, shape index: {}]   ;;  %s2255_s5 = inlined_call_operand.vmem [shape: f32[2,1,128], index: 5, kind: input, shape index: {}]   ;;  %s2256_s6 = inlined_call_operand.vmem [shape: bf16[2,32,32], index: 6, kind: input, shape index: {}]   ;;  %s2257_s7 = inlined_call_operand.vmem [shape: f32[2,1,32], index: 7, kind: input, shape index: {}]   ;;  %s2258_s8 = inlined_call_operand.vmem [shape: f32[2,1,32], index: 8, kind: input, shape index: {}]   ;;  %s2259_s9 = inlined_call_operand.vmem [shape: f32[2,1,32], index: 9, kind: input, shape index: {}]   ;;  %s2260_s10 = inlined_call_operand.vmem [shape: bf16[2,32,128], index: 10, kind: input, shape index: {}]   ;;  %s2261_s11 = inlined_call_operand.vmem [shape: f32[2,1,128], index: 11, kind: input, shape index: {}]   ;;  %s2262_s12 = inlined_call_operand.vmem [shape: bf16[2,128,32], index: 12, kind: input, shape index: {}]   ;;  %s2263_s13 = inlined_call_operand.vmem [shape: f32[2,1,32], index: 13, kind: input, shape index: {}]   ;;  %s2264_s14 = inlined_call_operand.vmem [shape: f32[2,1,32], index: 14, kind: input, shape index: {}]   ;;  %s2265_s15 = inlined_call_operand.vmem [shape: f32[2,1,32], index: 15, kind: input, shape index: {}]   ;;  %s2266_s16 = inlined_call_operand.vmem [shape: bf16[32,32], index: 16, kind: input, shape index: {}]   ;;  %s2267_s17 = inlined_call_operand.vmem [shape: f32[1,32], index: 17, kind: input, shape index: {}]   ;;  %s2268_s18 = inlined_call_operand.vmem [shape: bf16[32,128], index: 18, kind: input, shape index: {}]   ;;  %s2269_s19 = inlined_call_operand.vmem [shape: f32[1,128], index: 19, kind: input, shape index: {}]   ;;  %s2270_s20 = inlined_call_operand.hbm [shape: f32[2,128], index: 20, kind: output, shape index: {}]  }
   0x1   :  { %2278 = sst [smem:[#allocation6_spill]] %s2250_s0 }
   0x2   :  { %2279 = sst [smem:[#allocation7_spill]] %s2251_s1 }
   0x3   :  { %2280 = sst [smem:[#allocation8_spill]] %s2252_s2 }
   0x4   :  { %2281 = sst [smem:[#allocation9_spill]] %s2253_s3 }
   0x5   :  { %2282 = sst [smem:[#allocation10_spill]] %s2254_s4 }
   0x6   :  { %s2283_s23 = sld [smem:[#allocation6_spill]]  ;;  %vm71_vm0 = vcmask 261120  }
   0xc   :  { %v67_v0 = vld [vmem:[%s2283_s23] sm:$0xff]  ;;  %v1897_v1 = vld [vmem:[%s2283_s23 + $0x8] sm:$0xff] }
   0xd   :  { %v72_v2 = vsel %vm71_vm0, %v67_v0, 0.0  ;;  %v87_v3 = vmul.f32 %v67_v0, %v67_v0  ;;  %v75_v5 = vsel %vm71_vm0, %v1897_v1, 0.0  ;;  %v88_v6 = vmul.f32 %v1897_v1, %v1897_v1 }
   0xe   :  { %73 = vadd.xlane.f32.xlu0 %v72_v2 }
   0xf   :  { %v89_v4 = vsel %vm71_vm0, %v87_v3, 0.0 }
  0x10   :  { %90 = vadd.xlane.f32.xlu1 %v89_v4 }
  0x11   :  { %25 = vsyncpa [#allocation4], 0  ;;  %v92_v7 = vsel %vm71_vm0, %v88_v6, 0.0  ;;  %v1778_v8 = vmov 32.0   ;;  %s2284_s26 = sld [smem:[#allocation10_spill]]  ;;  %s1779_s24 = smov 80  }
  0x12   :  { %1688 = vrcp.f32 %v1778_v8  ;;  %s2285_s30 = sld [smem:[#allocation8_spill]]  ;;  %v1670_v56 = vld [vmem:[%s2255_s5] ss:$0 sm:$0xff]  ;;  %s1780_s2 = smov 64   ;;  %vm187_vm8 = vcmask 130048   ;;  %vm225_vm9 = vcmask 1043456  }
  0x13   :  { %s2286_s1 = sld [smem:[#allocation9_spill]]  ;;  %s1781_s25 = smov 96   ;;  %vm207_vm10 = vcmask 64512   ;;  %vm306_vm11 = vcmask 261248  }
  0x14   :  { %s1782_s3 = smov 112   ;;  %s2287_s4 = sld [smem:[#allocation7_spill]] }
  0x15   :  { %s2276_s0 = smov 48   ;;  %s2274_s21 = smov 16  }
  0x16   :  { %76 = vadd.xlane.f32.xlu0 %v75_v5 }
  0x17   :  { %v1629_v18 = vld [vmem:[%s2284_s26 + $0x8] sm:$0xff]  ;;  %v1628_v21 = vld [vmem:[%s2284_s26] sm:$0xff] }
  0x18   :  { %93 = vadd.xlane.f32.xlu1 %v92_v7  ;;  %v1689_v9 = vpop.eup %1688  ;;  %167 = vmatpush.bf16.msra.mxu0 %v1629_v18  ;;  %v1668_v45 = vld [vmem:[%s2285_s30] ss:$0 sm:$0xff]  ;;  %s1429_s30 = sshll.u32 %s2270_s20, 4  ;;  %s1430_s30 = int_to_ptr.hbm [resolvable:$true] %s1429_s30 }
  0x19   :  { %v79_v10 = vmul.f32 32.0, %v1689_v9  ;;  %vm83_vm1 = vweird.f32 %v1689_v9  ;;  %v1669_v51 = vld [vmem:[%s2286_s1] ss:$0 sm:$0xff] }
  0x1b   :  { %v80_v11 = vsub.f32 1.0, %v79_v10 }
  0x1c   :  { %168 = vmatpush.bf16.msra.mxu0 %v1628_v21 }
  0x1d   :  { %v81_v12 = vmul.f32 %v1689_v9, %v80_v11 }
  0x1f   :  { %v82_v13 = vadd.f32 %v1689_v9, %v81_v12 }
  0x21   :  { %v1906_v14 = vsel %vm83_vm1, %v1689_v9, %v82_v13 }
  0x81   :  { %v74_v15 = vpop.xlane.xlu0 %73 }
  0x82   :  { %v85_v16 = vmul.f32 %v1906_v14, %v74_v15  ;;  %v1952_v15 = vld [vmem:[%s2287_s4] sm:$0xff] }
  0x83   :  { %v91_v17 = vpop.xlane.xlu1 %90 }
  0x84   :  { %v97_v19 = vmul.f32 %v85_v16, %v85_v16  ;;  %v95_v20 = vmul.f32 %v91_v17, %v1906_v14  ;;  %v101_v42 = vsub.f32 %v67_v0, %v85_v16 }
  0x86   :  { %v99_v22 = vsub.f32 %v95_v20, %v97_v19 }
  0x88   :  { %v103_v23 = vadd.f32 1e-12, %v99_v22 }
  0x89   :  { %v77_v24 = vpop.xlane.xlu0 %76 }
  0x8a   :  { %1690 = vrsqrt.f32 %v103_v23  ;;  %v86_v25 = vmul.f32 %v1906_v14, %v77_v24  ;;  %vm111_vm3 = vweird.f32 %v103_v23 }
  0x8b   :  { %v94_v26 = vpop.xlane.xlu1 %93 }
  0x8c   :  { %v98_v27 = vmul.f32 %v86_v25, %v86_v25  ;;  %v96_v28 = vmul.f32 %v94_v26, %v1906_v14  ;;  %v102_v47 = vsub.f32 %v1897_v1, %v86_v25 }
  0x8e   :  { %v100_v29 = vsub.f32 %v96_v28, %v98_v27 }
  0x90   :  { %v1691_v30 = vpop.eup %1690  ;;  %v104_v31 = vadd.f32 1e-12, %v100_v29 }
  0x91   :  { %v106_v32 = vmul.f32 %v1691_v30, %v103_v23  ;;  %vm112_vm2 = vweird.f32 %v1691_v30 }
  0x92   :  { %1692 = vrsqrt.f32 %v104_v31  ;;  %vm113_vm4 = vmor %vm111_vm3, %vm112_vm2  ;;  %vm121_vm6 = vweird.f32 %v104_v31 }
  0x93   :  { %v107_v33 = vmul.f32 %v1691_v30, %v106_v32 }
  0x95   :  { %v108_v34 = vmul.f32 0.5, %v107_v33 }
  0x97   :  { %v109_v35 = vsub.f32 1.5, %v108_v34 }
  0x98   :  { %v1693_v36 = vpop.eup %1692 }
  0x99   :  { %v110_v37 = vmul.f32 %v1691_v30, %v109_v35  ;;  %v116_v38 = vmul.f32 %v1693_v36, %v104_v31  ;;  %vm122_vm5 = vweird.f32 %v1693_v36 }
  0x9a   :  { %vm123_vm7 = vmor %vm121_vm6, %vm122_vm5 }
  0x9b   :  { %v117_v39 = vmul.f32 %v1693_v36, %v116_v38  ;;  %v114_v40 = vsel %vm113_vm4, %v1691_v30, %v110_v37 }
  0x9c   :  { %v125_v44 = vmul.f32 %v114_v40, %v101_v42 }
  0x9d   :  { %v118_v41 = vmul.f32 0.5, %v117_v39 }
  0x9e   :  { %v130_v50 = vmul.f32 %v1668_v45, %v125_v44 }
  0x9f   :  { %v119_v43 = vsub.f32 1.5, %v118_v41 }
  0xa0   :  { %v1925_v53 = vadd.f32 %v1669_v51, %v130_v50 }
  0xa1   :  { %v120_v46 = vmul.f32 %v1693_v36, %v119_v43 }
  0xa3   :  { %v124_v48 = vsel %vm123_vm7, %v1693_v36, %v120_v46  ;;  %v1975_v46 = vld [vmem:[%s2287_s4 + $0x8] sm:$0xff] }
  0xa4   :  { %v126_v49 = vmul.f32 %v124_v48, %v102_v47 }
  0xa6   :  { %v131_v52 = vmul.f32 %v1668_v45, %v126_v49 }
  0xa8   :  { %v1927_v54 = vadd.f32 %v1669_v51, %v131_v52 }
  0xaa   :  { %v137_v55 = vpack.c.bf16 %v1927_v54, %v1925_v53 }
  0xac   :  { %1446 = vmatmul.msk.bf16.vlgmr.msra.gmra.mxu0 %vm71_vm0, %v137_v55 }
 0x129   :  { %v170_v57 = vpop.f32.mrf.mxu0 }
 0x12a   :  { %v171_v58 = vadd.f32 %v1670_v56, %v170_v57 }
 0x12c   :  { %v175_v59 = vmul.f32 0.25, %v171_v58  ;;  %v179_v60 = vpack.c.bf16 %v171_v58, %v171_v58 }
 0x12e   :  { %v183_v61 = vunpack.c.l.b16 %v179_v60  ;;  %v177_v62 = vpack.c.bf16 %v175_v59, %v175_v59 }
 0x130   :  { %v1935_v63 = vpack.c.b16 %v183_v61, %v183_v61  ;;  %v244_v3 = vunpack.c.l.b16 %v177_v62 }
 0x131   :  { %v172_v0 = vpop.f32.mrf.mxu0 }
 0x132   :  { %v173_v1 = vadd.f32 %v1670_v56, %v172_v0  ;;  %248 = vrot.lane.b32.xlu0 %v1935_v63, %s1779_s24  ;;  %220 = vrot.lane.b32.xlu1 %v1935_v63, %s1780_s2  ;;  %v245_v5 = vpack.c.b16 %v244_v3, %v244_v3 }
 0x133   :  { %185 = vrot.lane.b32.xlu2 %v1935_v63, %s1781_s25 }
 0x134   :  { %v176_v2 = vmul.f32 0.25, %v173_v1  ;;  %v180_v20 = vpack.c.bf16 %v173_v1, %v173_v1 }
 0x136   :  { %v178_v4 = vpack.c.bf16 %v176_v2, %v176_v2  ;;  %v311_v21 = vunpack.c.l.b16 %v180_v20 }
 0x138   :  { %v369_v6 = vunpack.c.l.b16 %v178_v4  ;;  %v1956_v22 = vpack.c.b16 %v311_v21, %v311_v21 }
 0x13a   :  { %246 = vrot.lane.b32.xlu1 %v245_v5, %s1782_s3  ;;  %v370_v7 = vpack.c.b16 %v369_v6, %v369_v6 }
 0x142   :  { %371 = vrot.lane.b32.xlu1 %v370_v7, %s1782_s3 }
 0x18d   :  { %v186_v8 = vpop.permute.xlu2 %185 }
 0x18e   :  { %v192_v9 = vsel %vm187_vm8, %v186_v8, 0 }
 0x18f   :  { %201 = vmatpush.bf16.xpose.msra.mxu1 %v192_v9 }
 0x196   :  { %1447 = vmatmul.msk.bf16.vlgmr.msra.gmra.mxu1 %vm187_vm8, %v177_v62 }
 0x1a4   :  { %v249_v10 = vpop.permute.xlu0 %248  ;;  %v221_v11 = vpop.permute.xlu1 %220 }
 0x1a5   :  { %v227_v12 = vsel %vm225_vm9, %v221_v11, 0  ;;  %v254_v13 = vsel %vm187_vm8, %v249_v10, 0 }
 0x1a6   :  { %236 = vmatpush.bf16.msra.mxu3 %v227_v12 }
 0x1aa   :  { %263 = vmatpush.bf16.xpose.msrb.mxu3 %v254_v13 }
 0x1ac   :  { %v247_v38 = vpop.permute.xlu1 %246 }
 0x1b4   :  { %v372_v39 = vpop.permute.xlu1 %371 }
 0x213   :  { %v203_v16 = vpop.f32.mrf.mxu1 }
 0x214   :  { %v204_v17 = vadd.f32 %v203_v16, %v1952_v15 }
 0x216   :  { %v208_v18 = vsel %vm207_vm10, %v204_v17, -inf }
 0x217   :  { %209 = vmax.xlane.f32.xlu2 %v208_v18 }
 0x21b   :  { %v205_v19 = vpop.f32.mrf.mxu1 }
 0x22f   :  { %313 = vrot.lane.b32.xlu2 %v1956_v22, %s1781_s25 }
 0x28a   :  { %v210_v23 = vpop.xlane.xlu2 %209 }
 0x28b   :  { %v211_v24 = vsub.f32 %v204_v17, %v210_v23 }
 0x28d   :  { %v212_v25 = vmul.f32 1.442695, %v211_v24 }
 0x28f   :  { %1694 = vpow2.f32 %v212_v25 }
 0x292   :  { %v314_v26 = vpop.permute.xlu2 %313 }
 0x293   :  { %v319_v27 = vsel %vm187_vm8, %v314_v26, 0 }
 0x294   :  { %328 = vmatpush.bf16.xpose.msrb.mxu0 %v319_v27 }
 0x295   :  { %v1695_v28 = vpop.eup %1694 }
 0x296   :  { %v214_v29 = vsel %vm207_vm10, %v1695_v28, 0.0 }
 0x297   :  { %215 = vadd.xlane.f32.xlu0 %v214_v29 }
 0x29b   :  { %1452 = vmatmul.msk.bf16.vlgmr.msrb.gmra.mxu0 %vm187_vm8, %v178_v4 }
 0x2ab   :  { %373 = vrot.lane.b32.xlu0 %v1956_v22, %s1779_s24 }
 0x30a   :  { %v216_v30 = vpop.xlane.xlu0 %215 }
 0x30b   :  { %1696 = vrcp.f32 %v216_v30 }
 0x311   :  { %v1697_v31 = vpop.eup %1696 }
 0x312   :  { %v218_v32 = vmul.f32 %v1697_v31, %v1695_v28 }
 0x314   :  { %v219_v33 = vpack.c.bf16 %v218_v32, %v218_v32  ;;  %v1631_v32 = vld [vmem:[%s2256_s6 + $0x8] sm:$0xff] }
 0x315   :  { %464 = vmatpush.bf16.msra.mxu0 %v1631_v32  ;;  %v1641_v32 = vld [vmem:[%s2262_s12 + $0x38] sm:$0xff] }
 0x316   :  { %1448 = vmatmul.msk.bf16.vlgmr.msra.gmra.mxu3 %vm207_vm10, %v219_v33  ;;  %v1630_v33 = vld [vmem:[%s2256_s6] sm:$0xff] }
 0x318   :  { %v330_v34 = vpop.f32.mrf.mxu0 }
 0x319   :  { %v331_v50 = vadd.f32 %v1975_v46, %v330_v34  ;;  %465 = vmatpush.bf16.msra.mxu0 %v1630_v33  ;;  %v1640_v33 = vld [vmem:[%s2262_s12 + $0x30] sm:$0xff] }
 0x31b   :  { %v334_v52 = vsel %vm207_vm10, %v331_v50, -inf }
 0x31d   :  { %v374_v35 = vpop.permute.xlu0 %373 }
 0x31e   :  { %v379_v36 = vsel %vm187_vm8, %v374_v35, 0 }
 0x31f   :  { %388 = vmatpush.bf16.xpose.msra.mxu3 %v379_v36 }
 0x320   :  { %v332_v37 = vpop.f32.mrf.mxu0 }
 0x326   :  { %1449 = vmatmul.msk.bf16.vlgmr.msrb.gmra.mxu3 %vm187_vm8, %v247_v38 }
 0x327   :  { %659 = vmatpush.bf16.msrb.mxu3 %v1641_v32 }
 0x32b   :  { %660 = vmatpush.bf16.msrb.mxu3 %v1640_v33 }
 0x336   :  { %1454 = vmatmul.msk.bf16.vlgmr.msra.gmra.mxu3 %vm187_vm8, %v372_v39  ;;  %v1671_v39 = vld [vmem:[%s2257_s7] ss:$0 sm:$0xff] }
 0x399   :  { %v238_v40 = vpop.f32.mrf.mxu3 }
 0x39a   :  { %242 = vst.msk [vmem:[#allocation2] sm:$0xff] %vm187_vm8, %v238_v40 }
 0x3a1   :  { %v240_v41 = vpop.f32.mrf.mxu3 }
 0x3a9   :  { %v265_v42 = vpop.f32.mrf.mxu3 }
 0x3aa   :  { %v266_v43 = vadd.f32 %v265_v42, %v1952_v15 }
 0x3ac   :  { %v269_v44 = vsel %vm207_vm10, %v266_v43, -inf }
 0x3ad   :  { %270 = vmax.xlane.f32.xlu0 %v269_v44 }
 0x3b1   :  { %v267_v45 = vpop.f32.mrf.mxu3 }
 0x3b9   :  { %v390_v47 = vpop.f32.mrf.mxu3 }
 0x3ba   :  { %v391_v48 = vadd.f32 %v1975_v46, %v390_v47 }
 0x3bc   :  { %v394_v49 = vsel %vm207_vm10, %v391_v48, -inf }
 0x3bd   :  { %395 = vmax.xlane.f32.xlu1 %v394_v49 }
 0x3c1   :  { %281 = vrot.lane.b32.xlu0 %v1935_v63, %s2276_s0  ;;  %v392_v51 = vpop.f32.mrf.mxu3 }
 0x3c5   :  { %335 = vmax.xlane.f32.xlu1 %v334_v52 }
 0x3c9   :  { %406 = vrot.lane.b32.xlu0 %v1956_v22, %s2276_s0 }
 0x420   :  { %v271_v55 = vpop.xlane.xlu0 %270 }
 0x421   :  { %v272_v56 = vsub.f32 %v266_v43, %v271_v55 }
 0x423   :  { %v273_v57 = vmul.f32 1.442695, %v272_v56 }
 0x425   :  { %1698 = vpow2.f32 %v273_v57  ;;  %v1633_v57 = vld [vmem:[%s2260_s10 + $0x8] sm:$0xff] }
 0x42b   :  { %v1699_v58 = vpop.eup %1698 }
 0x42c   :  { %v275_v59 = vsel %vm207_vm10, %v1699_v58, 0.0 }
 0x42d   :  { %276 = vadd.xlane.f32.xlu2 %v275_v59 }
 0x430   :  { %v396_v60 = vpop.xlane.xlu1 %395 }
 0x431   :  { %v397_v61 = vsub.f32 %v391_v48, %v396_v60  ;;  %v1632_v60 = vld [vmem:[%s2260_s10] sm:$0xff] }
 0x433   :  { %v398_v62 = vmul.f32 1.442695, %v397_v61  ;;  %v282_v0 = vpop.permute.xlu0 %281 }
 0x434   :  { %v287_v63 = vsel %vm225_vm9, %v282_v0, 0 }
 0x435   :  { %1700 = vpow2.f32 %v398_v62  ;;  %296 = vmatpush.bf16.msra.mxu2 %v287_v63 }
 0x438   :  { %v336_v1 = vpop.xlane.xlu1 %335 }
 0x439   :  { %v337_v2 = vsub.f32 %v331_v50, %v336_v1 }
 0x43b   :  { %v1701_v3 = vpop.eup %1700  ;;  %v338_v4 = vmul.f32 1.442695, %v337_v2  ;;  %v407_v5 = vpop.permute.xlu0 %406 }
 0x43c   :  { %v412_v6 = vsel %vm225_vm9, %v407_v5, 0  ;;  %v400_v7 = vsel %vm207_vm10, %v1701_v3, 0.0 }
 0x43d   :  { %1702 = vpow2.f32 %v338_v4  ;;  %421 = vmatpush.bf16.msrb.mxu2 %v412_v6  ;;  %401 = vadd.xlane.f32.xlu1 %v400_v7 }
 0x443   :  { %v1703_v8 = vpop.eup %1702 }
 0x444   :  { %v340_v9 = vsel %vm207_vm10, %v1703_v8, 0.0 }
 0x445   :  { %341 = vadd.xlane.f32.xlu2 %v340_v9 }
 0x456   :  { %346 = vrot.lane.b32.xlu1 %v1956_v22, %s1780_s2 }
 0x4a0   :  { %v277_v10 = vpop.xlane.xlu2 %276 }
 0x4a1   :  { %1704 = vrcp.f32 %v277_v10 }
 0x4a7   :  { %v1705_v11 = vpop.eup %1704 }
 0x4a8   :  { %v279_v12 = vmul.f32 %v1705_v11, %v1699_v58 }
 0x4aa   :  { %v280_v13 = vpack.c.bf16 %v279_v12, %v279_v12 }
 0x4ac   :  { %1450 = vmatmul.msk.bf16.vlgmr.msra.gmra.mxu2 %vm207_vm10, %v280_v13 }
 0x4b0   :  { %v402_v16 = vpop.xlane.xlu1 %401 }
 0x4b1   :  { %1706 = vrcp.f32 %v402_v16 }
 0x4b7   :  { %v1707_v17 = vpop.eup %1706 }
 0x4b8   :  { %v404_v18 = vmul.f32 %v1707_v17, %v1701_v3  ;;  %v342_v20 = vpop.xlane.xlu2 %341 }
 0x4b9   :  { %1708 = vrcp.f32 %v342_v20  ;;  %v1672_v20 = vld [vmem:[%s2258_s8] ss:$0 sm:$0xff] }
 0x4ba   :  { %v405_v19 = vpack.c.bf16 %v404_v18, %v404_v18 }
 0x4bc   :  { %1455 = vmatmul.msk.bf16.vlgmr.msrb.gmra.mxu2 %vm207_vm10, %v405_v19 }
 0x4bf   :  { %v1709_v21 = vpop.eup %1708 }
 0x4c0   :  { %v344_v23 = vmul.f32 %v1709_v21, %v1703_v8 }
 0x4c2   :  { %v345_v25 = vpack.c.bf16 %v344_v23, %v344_v23 }
 0x4c8   :  { %v347_v24 = vpop.permute.xlu1 %346 }
 0x4c9   :  { %v352_v22 = vsel %vm225_vm9, %v347_v24, 0 }
 0x4ca   :  { %361 = vmatpush.bf16.msrb.mxu1 %v352_v22 }
 0x4cd   :  { %1453 = vmatmul.msk.bf16.vlgmr.msrb.gmra.mxu1 %vm207_vm10, %v345_v25 }
 0x4ce   :  { %564 = vmatpush.bf16.msra.mxu1 %v1633_v57 }
 0x4d2   :  { %565 = vmatpush.bf16.msra.mxu1 %v1632_v60 }
 0x52f   :  { %v298_v26 = vpop.f32.mrf.mxu2 }
 0x530   :  { %303 = vrot.lane.b32.xlu0 %v298_v26, %s2274_s21 }
 0x537   :  { %v300_v27 = vpop.f32.mrf.mxu2 }
 0x538   :  { %v1673_v27 = vld [vmem:[%s2259_s9] ss:$0 sm:$0xff] }
 0x53f   :  { %v423_v28 = vpop.f32.mrf.mxu2 }
 0x540   :  { %428 = vrot.lane.b32.xlu2 %v423_v28, %s2274_s21 }
 0x547   :  { %v425_v29 = vpop.f32.mrf.mxu2 }
 0x54a   :  { %v363_v30 = vpop.f32.mrf.mxu1 }
 0x54b   :  { %367 = vst.msk [vmem:[#allocation2 + $0x8] sm:$0xff] %vm187_vm8, %v363_v30 }
 0x552   :  { %v365_v31 = vpop.f32.mrf.mxu1 }
 0x59a   :  { %v429_v34 = vpop.permute.xlu2 %428 }
 0x59b   :  { %431 = vst.msk [vmem:[#allocation2 + $0x8] sm:$0xff] %vm306_vm11, %v429_v34  ;;  %v1639_v34 = vld [vmem:[%s2262_s12 + $0x28] sm:$0xff] }
 0x59c   :  { %661 = vmatpush.bf16.msrb.mxu3 %v1639_v34 }
 0x5a2   :  { %v304_v35 = vpop.permute.xlu0 %303  ;;  %v433_v37 = vld [vmem:[#allocation2 + $0x8] sm:$0xff] }
 0x5a3   :  { %307 = vst.msk [vmem:[#allocation2] sm:$0xff] %vm306_vm11, %v304_v35  ;;  %v1638_v35 = vld [vmem:[%s2262_s12 + $0x20] sm:$0xff] }
 0x5a4   :  { %662 = vmatpush.bf16.msrb.mxu3 %v1638_v35 }
 0x5aa   :  { %v432_v36 = vld [vmem:[#allocation2] sm:$0xff] }
 0x5ab   :  { %v434_v38 = vpack.c.bf16 %v433_v37, %v432_v36  ;;  %v1637_v36 = vld [vmem:[%s2262_s12 + $0x18] sm:$0xff]  ;;  %v1636_v37 = vld [vmem:[%s2262_s12 + $0x10] sm:$0xff] }
 0x5ac   :  { %663 = vmatpush.bf16.msrb.mxu3 %v1637_v36 }
 0x5ad   :  { %1464 = vmatmul.msk.bf16.vlgmr.msra.gmra.mxu0 %vm71_vm0, %v434_v38  ;;  %v1635_v38 = vld [vmem:[%s2262_s12 + $0x8] sm:$0xff] }
 0x5b0   :  { %664 = vmatpush.bf16.msrb.mxu3 %v1636_v37 }
 0x5b4   :  { %665 = vmatpush.bf16.msrb.mxu3 %v1635_v38 }
 0x62a   :  { %v467_v40 = vpop.f32.mrf.mxu0 }
 0x62b   :  { %v468_v41 = vadd.f32 %v1671_v39, %v467_v40  ;;  %v1634_v40 = vld [vmem:[%s2262_s12] sm:$0xff] }
 0x62c   :  { %666 = vmatpush.bf16.msrb.mxu3 %v1634_v40 }
 0x62d   :  { %v472_v42 = vadd.f32 %v468_v41, %v1925_v53 }
 0x62f   :  { %v476_v43 = vsel %vm71_vm0, %v472_v42, 0.0  ;;  %v484_v44 = vmul.f32 %v472_v42, %v472_v42 }
 0x630   :  { %477 = vadd.xlane.f32.xlu0 %v476_v43 }
 0x631   :  { %v486_v45 = vsel %vm71_vm0, %v484_v44, 0.0 }
 0x632   :  { %v469_v47 = vpop.f32.mrf.mxu0  ;;  %487 = vadd.xlane.f32.xlu2 %v486_v45 }
 0x633   :  { %v470_v48 = vadd.f32 %v1671_v39, %v469_v47  ;;  %v1674_v39 = vld [vmem:[%s2261_s11] ss:$0 sm:$0xff] }
 0x635   :  { %v473_v49 = vadd.f32 %v470_v48, %v1927_v54 }
 0x637   :  { %v479_v50 = vsel %vm71_vm0, %v473_v49, 0.0  ;;  %v485_v51 = vmul.f32 %v473_v49, %v473_v49 }
 0x638   :  { %480 = vadd.xlane.f32.xlu1 %v479_v50 }
 0x639   :  { %v489_v52 = vsel %vm71_vm0, %v485_v51, 0.0 }
 0x63a   :  { %490 = vadd.xlane.f32.xlu0 %v489_v52 }
 0x6a3   :  { %v478_v55 = vpop.xlane.xlu0 %477 }
 0x6a4   :  { %v482_v53 = vmul.f32 %v478_v55, %v1906_v14 }
 0x6a5   :  { %v488_v56 = vpop.xlane.xlu2 %487 }
 0x6a6   :  { %v494_v58 = vmul.f32 %v482_v53, %v482_v53  ;;  %v492_v59 = vmul.f32 %v488_v56, %v1906_v14  ;;  %v498_v18 = vsub.f32 %v472_v42, %v482_v53 }
 0x6a8   :  { %v496_v54 = vsub.f32 %v492_v59, %v494_v58 }
 0x6aa   :  { %v500_v61 = vadd.f32 1e-12, %v496_v54 }
 0x6ab   :  { %v481_v62 = vpop.xlane.xlu1 %480 }
 0x6ac   :  { %1710 = vrsqrt.f32 %v500_v61  ;;  %v483_v0 = vmul.f32 %v481_v62, %v1906_v14  ;;  %vm508_vm13 = vweird.f32 %v500_v61 }
 0x6ad   :  { %v491_v63 = vpop.xlane.xlu0 %490 }
 0x6ae   :  { %v495_v1 = vmul.f32 %v483_v0, %v483_v0  ;;  %v493_v2 = vmul.f32 %v491_v63, %v1906_v14  ;;  %v499_v24 = vsub.f32 %v473_v49, %v483_v0 }
 0x6b0   :  { %v497_v3 = vsub.f32 %v493_v2, %v495_v1  ;;  %v1675_v1 = vld [vmem:[%s2263_s13] ss:$0 sm:$0xff] }
 0x6b2   :  { %v1711_v4 = vpop.eup %1710  ;;  %v501_v5 = vadd.f32 1e-12, %v497_v3 }
 0x6b3   :  { %v503_v6 = vmul.f32 %v1711_v4, %v500_v61  ;;  %vm509_vm12 = vweird.f32 %v1711_v4 }
 0x6b4   :  { %1712 = vrsqrt.f32 %v501_v5  ;;  %vm510_vm14 = vmor %vm508_vm13, %vm509_vm12  ;;  %vm518_vm1 = vweird.f32 %v501_v5 }
 0x6b5   :  { %v504_v7 = vmul.f32 %v1711_v4, %v503_v6 }
 0x6b7   :  { %v505_v8 = vmul.f32 0.5, %v504_v7 }
 0x6b9   :  { %v506_v9 = vsub.f32 1.5, %v505_v8 }
 0x6ba   :  { %v1713_v10 = vpop.eup %1712 }
 0x6bb   :  { %v507_v11 = vmul.f32 %v1711_v4, %v506_v9  ;;  %v513_v12 = vmul.f32 %v1713_v10, %v501_v5  ;;  %vm519_vm15 = vweird.f32 %v1713_v10 }
 0x6bc   :  { %vm520_vm2 = vmor %vm518_vm1, %vm519_vm15 }
 0x6bd   :  { %v514_v13 = vmul.f32 %v1713_v10, %v513_v12  ;;  %v511_v16 = vsel %vm510_vm14, %v1711_v4, %v507_v11 }
 0x6be   :  { %v522_v21 = vmul.f32 %v511_v16, %v498_v18 }
 0x6bf   :  { %v515_v17 = vmul.f32 0.5, %v514_v13 }
 0x6c0   :  { %v527_v25 = vmul.f32 %v1672_v20, %v522_v21 }
 0x6c1   :  { %v516_v19 = vsub.f32 1.5, %v515_v17 }
 0x6c2   :  { %v532_v29 = vadd.f32 %v1673_v27, %v527_v25 }
 0x6c3   :  { %v517_v23 = vmul.f32 %v1713_v10, %v516_v19  ;;  %v1643_v19 = vld [vmem:[%s2284_s26 + $0x18] sm:$0xff] }
 0x6c4   :  { %767 = vmatpush.bf16.msra.mxu2 %v1643_v19 }
 0x6c5   :  { %v521_v22 = vsel %vm520_vm2, %v1713_v10, %v517_v23 }
 0x6c6   :  { %v523_v26 = vmul.f32 %v521_v22, %v499_v24  ;;  %v1642_v24 = vld [vmem:[%s2284_s26 + $0x10] sm:$0xff] }
 0x6c8   :  { %v528_v28 = vmul.f32 %v1672_v20, %v523_v26  ;;  %768 = vmatpush.bf16.msra.mxu2 %v1642_v24 }
 0x6ca   :  { %v533_v30 = vadd.f32 %v1673_v27, %v528_v28 }
 0x6cc   :  { %v534_v31 = vpack.c.bf16 %v533_v30, %v532_v29 }
 0x6ce   :  { %1473 = vmatmul.msk.bf16.vlgmr.msra.gmra.mxu1 %vm71_vm0, %v534_v31 }
 0x74b   :  { %v567_v41 = vpop.f32.mrf.mxu1 }
 0x74c   :  { %v568_v42 = vadd.f32 %v1674_v39, %v567_v41 }
 0x74e   :  { %v572_v43 = vmul.f32 %v568_v42, %v568_v42 }
 0x750   :  { %v574_v44 = vmul.f32 %v572_v43, %v568_v42 }
 0x752   :  { %v576_v45 = vmul.f32 0.044715, %v574_v44 }
 0x753   :  { %v569_v47 = vpop.f32.mrf.mxu1 }
 0x754   :  { %v578_v48 = vadd.f32 %v576_v45, %v568_v42  ;;  %v570_v49 = vadd.f32 %v1674_v39, %v569_v47  ;;  %v1676_v45 = vld [vmem:[%s2264_s14] ss:$0 sm:$0xff] }
 0x756   :  { %v580_v50 = vmul.f32 0.7978846, %v578_v48  ;;  %v573_v51 = vmul.f32 %v570_v49, %v570_v49 }
 0x758   :  { %v575_v52 = vmul.f32 %v573_v51, %v570_v49  ;;  %1714 = vtanh.f32 %v580_v50 }
 0x75a   :  { %v577_v55 = vmul.f32 0.044715, %v575_v52 }
 0x75c   :  { %v579_v53 = vadd.f32 %v577_v55, %v570_v49  ;;  %v1677_v55 = vld [vmem:[%s2265_s15] ss:$0 sm:$0xff] }
 0x75e   :  { %v581_v56 = vmul.f32 0.7978846, %v579_v53  ;;  %v1715_v57 = vpop.eup %1714 }
 0x75f   :  { %v584_v58 = vadd.f32 1.0, %v1715_v57 }
 0x760   :  { %1716 = vtanh.f32 %v581_v56 }
 0x761   :  { %v586_v54 = vmul.f32 0.5, %v584_v58 }
 0x763   :  { %v588_v62 = vmul.f32 %v586_v54, %v568_v42 }
 0x766   :  { %v1717_v59 = vpop.eup %1716 }
 0x767   :  { %v585_v60 = vadd.f32 1.0, %v1717_v59  ;;  %v1678_v59 = vld [vmem:[%s2255_s5 + $0x1] ss:$0 sm:$0xff]  ;;  %s2288_s5 = smov 48  }
 0x769   :  { %v587_v61 = vmul.f32 0.5, %v585_v60 }
 0x76b   :  { %v589_v0 = vmul.f32 %v587_v61, %v570_v49 }
 0x76d   :  { %v590_v63 = vpack.c.bf16 %v589_v0, %v588_v62 }
 0x76f   :  { %667 = vmatmul.bf16.vlgmr.msrb.gmra.mxu3 %v590_v63 }
 0x7f2   :  { %v668_v2 = vpop.f32.mrf.mxu3 }
 0x7f3   :  { %v669_v3 = vadd.f32 %v1675_v1, %v668_v2 }
 0x7f5   :  { %v673_v4 = vadd.f32 %v669_v3, %v532_v29 }
 0x7f7   :  { %v677_v5 = vsel %vm71_vm0, %v673_v4, 0.0  ;;  %v685_v6 = vmul.f32 %v673_v4, %v673_v4 }
 0x7f8   :  { %678 = vadd.xlane.f32.xlu0 %v677_v5 }
 0x7f9   :  { %v687_v7 = vsel %vm71_vm0, %v685_v6, 0.0 }
 0x7fa   :  { %v670_v8 = vpop.f32.mrf.mxu3  ;;  %688 = vadd.xlane.f32.xlu2 %v687_v7 }
 0x7fb   :  { %v671_v9 = vadd.f32 %v1675_v1, %v670_v8 }
 0x7fd   :  { %v674_v10 = vadd.f32 %v671_v9, %v533_v30 }
 0x7ff   :  { %v680_v11 = vsel %vm71_vm0, %v674_v10, 0.0  ;;  %v686_v12 = vmul.f32 %v674_v10, %v674_v10 }
 0x800   :  { %681 = vadd.xlane.f32.xlu1 %v680_v11 }
 0x801   :  { %v690_v13 = vsel %vm71_vm0, %v686_v12, 0.0 }
 0x802   :  { %691 = vadd.xlane.f32.xlu0 %v690_v13 }
 0x86b   :  { %v679_v16 = vpop.xlane.xlu0 %678 }
 0x86c   :  { %v683_v17 = vmul.f32 %v679_v16, %v1906_v14 }
 0x86d   :  { %v689_v18 = vpop.xlane.xlu2 %688 }
 0x86e   :  { %v695_v20 = vmul.f32 %v683_v17, %v683_v17  ;;  %v693_v21 = vmul.f32 %v689_v18, %v1906_v14  ;;  %v699_v43 = vsub.f32 %v673_v4, %v683_v17 }
 0x870   :  { %v697_v23 = vsub.f32 %v693_v21, %v695_v20 }
 0x872   :  { %v701_v22 = vadd.f32 1e-12, %v697_v23 }
 0x873   :  { %v682_v25 = vpop.xlane.xlu1 %681 }
 0x874   :  { %1718 = vrsqrt.f32 %v701_v22  ;;  %v684_v26 = vmul.f32 %v682_v25, %v1906_v14  ;;  %vm709_vm4 = vweird.f32 %v701_v22 }
 0x875   :  { %v692_v27 = vpop.xlane.xlu0 %691 }
 0x876   :  { %v696_v28 = vmul.f32 %v684_v26, %v684_v26  ;;  %v694_v29 = vmul.f32 %v692_v27, %v1906_v14  ;;  %v700_v49 = vsub.f32 %v674_v10, %v684_v26 }
 0x878   :  { %v698_v30 = vsub.f32 %v694_v29, %v696_v28 }
 0x87a   :  { %v1719_v31 = vpop.eup %1718  ;;  %v702_v32 = vadd.f32 1e-12, %v698_v30 }
 0x87b   :  { %v704_v33 = vmul.f32 %v1719_v31, %v701_v22  ;;  %vm710_vm3 = vweird.f32 %v1719_v31 }
 0x87c   :  { %1720 = vrsqrt.f32 %v702_v32  ;;  %vm711_vm5 = vmor %vm709_vm4, %vm710_vm3  ;;  %vm719_vm7 = vweird.f32 %v702_v32 }
 0x87d   :  { %v705_v34 = vmul.f32 %v1719_v31, %v704_v33 }
 0x87f   :  { %v706_v35 = vmul.f32 0.5, %v705_v34 }
 0x881   :  { %v707_v36 = vsub.f32 1.5, %v706_v35 }
 0x882   :  { %v1721_v37 = vpop.eup %1720 }
 0x883   :  { %v708_v38 = vmul.f32 %v1719_v31, %v707_v36  ;;  %v714_v39 = vmul.f32 %v1721_v37, %v702_v32  ;;  %vm720_vm6 = vweird.f32 %v1721_v37 }
 0x884   :  { %vm721_vm12 = vmor %vm719_vm7, %vm720_vm6  ;;  %vm1343_vm6 = vcmask 1040384  }
 0x885   :  { %v715_v40 = vmul.f32 %v1721_v37, %v714_v39  ;;  %v712_v41 = vsel %vm711_vm5, %v1719_v31, %v708_v38 }
 0x886   :  { %v723_v47 = vmul.f32 %v712_v41, %v699_v43 }
 0x887   :  { %v716_v42 = vmul.f32 0.5, %v715_v40 }
 0x888   :  { %v728_v51 = vmul.f32 %v1676_v45, %v723_v47 }
 0x889   :  { %v717_v44 = vsub.f32 1.5, %v716_v42 }
 0x88a   :  { %v2084_v56 = vadd.f32 %v1677_v55, %v728_v51 }
 0x88b   :  { %v718_v48 = vmul.f32 %v1721_v37, %v717_v44 }
 0x88d   :  { %v722_v50 = vsel %vm721_vm12, %v1721_v37, %v718_v48 }
 0x88e   :  { %v724_v52 = vmul.f32 %v722_v50, %v700_v49 }
 0x890   :  { %v729_v53 = vmul.f32 %v1676_v45, %v724_v52 }
 0x892   :  { %v2086_v57 = vadd.f32 %v1677_v55, %v729_v53 }
 0x894   :  { %v735_v58 = vpack.c.bf16 %v2086_v57, %v2084_v56 }
 0x896   :  { %1519 = vmatmul.msk.bf16.vlgmr.msra.gmra.mxu2 %vm71_vm0, %v735_v58 }
 0x919   :  { %v770_v54 = vpop.f32.mrf.mxu2 }
 0x91a   :  { %v771_v60 = vadd.f32 %v1678_v59, %v770_v54 }
 0x91c   :  { %v779_v61 = vpack.c.bf16 %v771_v60, %v771_v60  ;;  %v775_v13 = vmul.f32 0.25, %v771_v60 }
 0x91e   :  { %v783_v62 = vunpack.c.l.b16 %v779_v61  ;;  %v777_v16 = vpack.c.bf16 %v775_v13, %v775_v13 }
 0x920   :  { %v2094_v0 = vpack.c.b16 %v783_v62, %v783_v62  ;;  %v841_v26 = vunpack.c.l.b16 %v777_v16 }
 0x921   :  { %v772_v63 = vpop.f32.mrf.mxu2 }
 0x922   :  { %v773_v1 = vadd.f32 %v1678_v59, %v772_v63  ;;  %845 = vrot.lane.b32.xlu0 %v2094_v0, %s1779_s24  ;;  %785 = vrot.lane.b32.xlu1 %v2094_v0, %s1781_s25  ;;  %v842_v27 = vpack.c.b16 %v841_v26, %v841_v26 }
 0x924   :  { %v776_v2 = vmul.f32 0.25, %v773_v1  ;;  %v780_v3 = vpack.c.bf16 %v773_v1, %v773_v1 }
 0x926   :  { %v778_v4 = vpack.c.bf16 %v776_v2, %v776_v2  ;;  %v906_v5 = vunpack.c.l.b16 %v780_v3 }
 0x928   :  { %v2100_v6 = vpack.c.b16 %v906_v5, %v906_v5  ;;  %v964_v7 = vunpack.c.l.b16 %v778_v4 }
 0x92a   :  { %968 = vrot.lane.b32.xlu1 %v2100_v6, %s1779_s24  ;;  %v965_v8 = vpack.c.b16 %v964_v7, %v964_v7  ;;  %s2289_s24 = smov 16  }
 0x92c   :  { %966 = vrot.lane.b32.xlu0 %v965_v8, %s1782_s3 }
 0x934   :  { %818 = vrot.lane.b32.xlu0 %v2094_v0, %s1780_s2 }
 0x994   :  { %v846_v9 = vpop.permute.xlu0 %845  ;;  %v786_v10 = vpop.permute.xlu1 %785 }
 0x995   :  { %v851_v11 = vsel %vm187_vm8, %v846_v9, 0  ;;  %v791_v12 = vsel %vm187_vm8, %v786_v10, 0 }
 0x996   :  { %800 = vmatpush.bf16.xpose.msrb.mxu0 %v791_v12  ;;  %860 = vmatpush.bf16.xpose.msrb.mxu2 %v851_v11 }
 0x99c   :  { %v969_v17 = vpop.permute.xlu1 %968 }
 0x99d   :  { %v974_v18 = vsel %vm187_vm8, %v969_v17, 0  ;;  %1520 = vmatmul.msk.bf16.vlgmr.msrb.gmra.mxu0 %vm187_vm8, %v777_v16 }
 0x99e   :  { %v967_v19 = vpop.permute.xlu0 %966  ;;  %983 = vmatpush.bf16.xpose.msra.mxu2 %v974_v18 }
 0x9a6   :  { %v819_v20 = vpop.permute.xlu0 %818 }
 0x9a7   :  { %v824_v21 = vsel %vm225_vm9, %v819_v20, 0 }
 0x9a8   :  { %833 = vmatpush.bf16.msrb.mxu1 %v824_v21 }
 0xa1a   :  { %v802_v23 = vpop.f32.mrf.mxu0 }
 0xa1b   :  { %v803_v24 = vadd.f32 %v802_v23, %v1952_v15 }
 0xa1d   :  { %v806_v22 = vsel %vm207_vm10, %v803_v24, -inf }
 0xa1e   :  { %807 = vmax.xlane.f32.xlu2 %v806_v22 }
 0xa22   :  { %v804_v25 = vpop.f32.mrf.mxu0 }
 0xa36   :  { %843 = vrot.lane.b32.xlu2 %v842_v27, %s1782_s3  ;;  %s1785_s3 = smov [#allocation3]  }
 0xa3e   :  { %908 = vrot.lane.b32.xlu2 %v2100_v6, %s1781_s25 }
 0xa91   :  { %v808_v28 = vpop.xlane.xlu2 %807 }
 0xa92   :  { %v809_v29 = vsub.f32 %v803_v24, %v808_v28 }
 0xa94   :  { %v810_v30 = vmul.f32 1.442695, %v809_v29 }
 0xa96   :  { %1722 = vpow2.f32 %v810_v30 }
 0xa99   :  { %v844_v31 = vpop.permute.xlu2 %843 }
 0xa9a   :  { %1522 = vmatmul.msk.bf16.vlgmr.msrb.gmra.mxu2 %vm187_vm8, %v844_v31  ;;  %v1645_v31 = vld [vmem:[%s2256_s6 + $0x18] sm:$0xff] }
 0xa9c   :  { %v1723_v32 = vpop.eup %1722 }
 0xa9d   :  { %v812_v33 = vsel %vm207_vm10, %v1723_v32, 0.0 }
 0xa9e   :  { %813 = vadd.xlane.f32.xlu1 %v812_v33 }
 0xaa1   :  { %v909_v34 = vpop.permute.xlu2 %908 }
 0xaa2   :  { %v914_v35 = vsel %vm187_vm8, %v909_v34, 0 }
 0xaa3   :  { %923 = vmatpush.bf16.xpose.msra.mxu1 %v914_v35 }
 0xaaa   :  { %1527 = vmatmul.msk.bf16.vlgmr.msra.gmra.mxu2 %vm187_vm8, %v967_v19 }
 0xb11   :  { %v814_v36 = vpop.xlane.xlu1 %813 }
 0xb12   :  { %1724 = vrcp.f32 %v814_v36 }
 0xb18   :  { %v1725_v37 = vpop.eup %1724 }
 0xb19   :  { %v816_v38 = vmul.f32 %v1725_v37, %v1723_v32  ;;  %v1644_v32 = vld [vmem:[%s2256_s6 + $0x10] sm:$0xff] }
 0xb1b   :  { %v817_v39 = vpack.c.bf16 %v816_v38, %v816_v38 }
 0xb1d   :  { %1521 = vmatmul.msk.bf16.vlgmr.msrb.gmra.mxu1 %vm207_vm10, %v817_v39  ;;  %v862_v40 = vpop.f32.mrf.mxu2  ;;  %v1679_v39 = vld [vmem:[%s2257_s7 + $0x1] ss:$0 sm:$0xff] }
 0xb1e   :  { %v863_v41 = vadd.f32 %v862_v40, %v1952_v15  ;;  %1061 = vmatpush.bf16.msrb.mxu1 %v1645_v31  ;;  %v1654_v31 = vld [vmem:[%s2262_s12 + $0x70] sm:$0xff] }
 0xb20   :  { %v866_v42 = vsel %vm207_vm10, %v863_v41, -inf }
 0xb21   :  { %867 = vmax.xlane.f32.xlu0 %v866_v42 }
 0xb22   :  { %1062 = vmatpush.bf16.msrb.mxu1 %v1644_v32  ;;  %v1653_v32 = vld [vmem:[%s2262_s12 + $0x68] sm:$0xff] }
 0xb25   :  { %v864_v43 = vpop.f32.mrf.mxu2 }
 0xb2d   :  { %1525 = vmatmul.msk.bf16.vlgmr.msra.gmra.mxu1 %vm187_vm8, %v778_v4  ;;  %v985_v44 = vpop.f32.mrf.mxu2 }
 0xb2e   :  { %v986_v45 = vadd.f32 %v1975_v46, %v985_v44 }
 0xb30   :  { %v989_v47 = vsel %vm207_vm10, %v986_v45, -inf }
 0xb31   :  { %990 = vmax.xlane.f32.xlu2 %v989_v47 }
 0xb35   :  { %v987_v48 = vpop.f32.mrf.mxu2  ;;  %878 = vrot.lane.b32.xlu0 %v2094_v0, %s2288_s5 }
 0xb94   :  { %v868_v49 = vpop.xlane.xlu0 %867 }
 0xb95   :  { %v869_v50 = vsub.f32 %v863_v41, %v868_v49 }
 0xb97   :  { %v870_v51 = vmul.f32 1.442695, %v869_v50 }
 0xb99   :  { %1726 = vpow2.f32 %v870_v51 }
 0xb9a   :  { %v835_v15 = vpop.f32.mrf.mxu1 }
 0xb9b   :  { %839 = vst.msk [vmem:[#allocation2] sm:$0xff] %vm187_vm8, %v835_v15 }
 0xb9f   :  { %v1727_v52 = vpop.eup %1726 }
 0xba0   :  { %v872_v55 = vsel %vm207_vm10, %v1727_v52, 0.0 }
 0xba1   :  { %873 = vadd.xlane.f32.xlu1 %v872_v55 }
 0xba2   :  { %v837_v53 = vpop.f32.mrf.mxu1 }
 0xba3   :  { %v1647_v53 = vld [vmem:[%s2260_s10 + $0x18] sm:$0xff] }
 0xba4   :  { %v991_v58 = vpop.xlane.xlu2 %990 }
 0xba5   :  { %v992_v59 = vsub.f32 %v986_v45, %v991_v58 }
 0xba7   :  { %v993_v54 = vmul.f32 1.442695, %v992_v59  ;;  %v879_v60 = vpop.permute.xlu0 %878 }
 0xba8   :  { %v884_v61 = vsel %vm225_vm9, %v879_v60, 0 }
 0xba9   :  { %1728 = vpow2.f32 %v993_v54  ;;  %893 = vmatpush.bf16.msra.mxu0 %v884_v61  ;;  %v1646_v54 = vld [vmem:[%s2260_s10 + $0x10] sm:$0xff] }
 0xbaa   :  { %v925_v62 = vpop.f32.mrf.mxu1 }
 0xbab   :  { %v926_v0 = vadd.f32 %v1975_v46, %v925_v62 }
 0xbad   :  { %v929_v63 = vsel %vm207_vm10, %v926_v0, -inf }
 0xbae   :  { %930 = vmax.xlane.f32.xlu1 %v929_v63 }
 0xbaf   :  { %v1729_v1 = vpop.eup %1728 }
 0xbb0   :  { %v995_v2 = vsel %vm207_vm10, %v1729_v1, 0.0 }
 0xbb1   :  { %996 = vadd.xlane.f32.xlu2 %v995_v2 }
 0xbb2   :  { %v927_v3 = vpop.f32.mrf.mxu1 }
 0xbc7   :  { %1001 = vrot.lane.b32.xlu1 %v2100_v6, %s2288_s5 }
 0xc14   :  { %v874_v4 = vpop.xlane.xlu1 %873 }
 0xc15   :  { %1730 = vrcp.f32 %v874_v4 }
 0xc1b   :  { %v1731_v5 = vpop.eup %1730 }
 0xc1c   :  { %v876_v7 = vmul.f32 %v1731_v5, %v1727_v52 }
 0xc1e   :  { %v877_v8 = vpack.c.bf16 %v876_v7, %v876_v7 }
 0xc20   :  { %1523 = vmatmul.msk.bf16.vlgmr.msra.gmra.mxu0 %vm207_vm10, %v877_v8 }
 0xc21   :  { %v931_v9 = vpop.xlane.xlu1 %930 }
 0xc22   :  { %v932_v46 = vsub.f32 %v926_v0, %v931_v9 }
 0xc24   :  { %v933_v10 = vmul.f32 1.442695, %v932_v46  ;;  %v997_v12 = vpop.xlane.xlu2 %996 }
 0xc26   :  { %1732 = vpow2.f32 %v933_v10 }
 0xc27   :  { %1734 = vrcp.f32 %v997_v12 }
 0xc2c   :  { %v1733_v11 = vpop.eup %1732 }
 0xc2d   :  { %v935_v13 = vsel %vm207_vm10, %v1733_v11, 0.0  ;;  %v1735_v16 = vpop.eup %1734 }
 0xc2e   :  { %936 = vadd.xlane.f32.xlu2 %v935_v13  ;;  %v999_v17 = vmul.f32 %v1735_v16, %v1729_v1 }
 0xc30   :  { %v1000_v20 = vpack.c.bf16 %v999_v17, %v999_v17 }
 0xc39   :  { %v1002_v18 = vpop.permute.xlu1 %1001 }
 0xc3a   :  { %v1007_v19 = vsel %vm225_vm9, %v1002_v18, 0 }
 0xc3b   :  { %1016 = vmatpush.bf16.msrb.mxu0 %v1007_v19  ;;  %v1680_v19 = vld [vmem:[%s2258_s8 + $0x1] ss:$0 sm:$0xff] }
 0xc3e   :  { %1528 = vmatmul.msk.bf16.vlgmr.msrb.gmra.mxu0 %vm207_vm10, %v1000_v20 }
 0xc46   :  { %941 = vrot.lane.b32.xlu2 %v2100_v6, %s1780_s2 }
 0xc9d   :  { %v895_v21 = vpop.f32.mrf.mxu0 }
 0xc9e   :  { %900 = vrot.lane.b32.xlu0 %v895_v21, %s2289_s24 }
 0xca1   :  { %v937_v23 = vpop.xlane.xlu2 %936 }
 0xca2   :  { %1736 = vrcp.f32 %v937_v23 }
 0xca5   :  { %v897_v24 = vpop.f32.mrf.mxu0 }
 0xca8   :  { %v1737_v22 = vpop.eup %1736 }
 0xca9   :  { %v939_v25 = vmul.f32 %v1737_v22, %v1733_v11  ;;  %v942_v26 = vpop.permute.xlu2 %941 }
 0xcaa   :  { %v947_v27 = vsel %vm225_vm9, %v942_v26, 0  ;;  %v1681_v26 = vld [vmem:[%s2259_s9 + $0x1] ss:$0 sm:$0xff] }
 0xcab   :  { %v940_v28 = vpack.c.bf16 %v939_v25, %v939_v25  ;;  %956 = vmatpush.bf16.msra.mxu3 %v947_v27 }
 0xcae   :  { %1526 = vmatmul.msk.bf16.vlgmr.msra.gmra.mxu3 %vm207_vm10, %v940_v28 }
 0xcaf   :  { %1165 = vmatpush.bf16.msrb.mxu3 %v1647_v53 }
 0xcb3   :  { %1166 = vmatpush.bf16.msrb.mxu3 %v1646_v54 }
 0xcbb   :  { %v1018_v29 = vpop.f32.mrf.mxu0 }
 0xcbc   :  { %1023 = vrot.lane.b32.xlu0 %v1018_v29, %s2289_s24 }
 0xcc3   :  { %v1020_v30 = vpop.f32.mrf.mxu0 }
 0xd10   :  { %v901_v6 = vpop.permute.xlu0 %900 }
 0xd11   :  { %903 = vst.msk [vmem:[#allocation2] sm:$0xff] %vm306_vm11, %v901_v6  ;;  %v1655_v6 = vld [vmem:[%s2262_s12 + $0x78] sm:$0xff] }
 0xd12   :  { %1262 = vmatpush.bf16.msrb.mxu2 %v1655_v6 }
 0xd16   :  { %1263 = vmatpush.bf16.msrb.mxu2 %v1654_v31 }
 0xd18   :  { %v1027_v36 = vld [vmem:[#allocation2] sm:$0xff] }
 0xd1a   :  { %1264 = vmatpush.bf16.msrb.mxu2 %v1653_v32 }
 0xd2e   :  { %v1024_v34 = vpop.permute.xlu0 %1023 }
 0xd31   :  { %v958_v33 = vpop.f32.mrf.mxu3 }
 0xd32   :  { %962 = vst.msk [vmem:[#allocation2 + $0x8] sm:$0xff] %vm187_vm8, %v958_v33  ;;  %v1652_v33 = vld [vmem:[%s2262_s12 + $0x60] sm:$0xff] }
 0xd33   :  { %1026 = vst.msk [vmem:[#allocation2 + $0x8] sm:$0xff] %vm306_vm11, %v1024_v34  ;;  %1265 = vmatpush.bf16.msrb.mxu2 %v1652_v33  ;;  %v1651_v34 = vld [vmem:[%s2262_s12 + $0x58] sm:$0xff] }
 0xd37   :  { %1266 = vmatpush.bf16.msrb.mxu2 %v1651_v34 }
 0xd39   :  { %v960_v35 = vpop.f32.mrf.mxu3 }
 0xd3a   :  { %v1028_v37 = vld [vmem:[#allocation2 + $0x8] sm:$0xff]  ;;  %v1650_v35 = vld [vmem:[%s2262_s12 + $0x50] sm:$0xff] }
 0xd3b   :  { %v1029_v38 = vpack.c.bf16 %v1028_v37, %v1027_v36  ;;  %1267 = vmatpush.bf16.msrb.mxu2 %v1650_v35  ;;  %v1649_v36 = vld [vmem:[%s2262_s12 + $0x48] sm:$0xff]  ;;  %v1682_v37 = vld [vmem:[%s2261_s11 + $0x1] ss:$0 sm:$0xff] }
 0xd3d   :  { %1542 = vmatmul.msk.bf16.vlgmr.msrb.gmra.mxu1 %vm71_vm0, %v1029_v38  ;;  %v1648_v38 = vld [vmem:[%s2262_s12 + $0x40] sm:$0xff] }
 0xd3f   :  { %1268 = vmatpush.bf16.msrb.mxu2 %v1649_v36 }
 0xd43   :  { %1269 = vmatpush.bf16.msrb.mxu2 %v1648_v38  ;;  %v1684_v38 = vld [vmem:[%s2264_s14 + $0x1] ss:$0 sm:$0xff] }
 0xdba   :  { %v1064_v40 = vpop.f32.mrf.mxu1 }
 0xdbb   :  { %v1065_v41 = vadd.f32 %v1679_v39, %v1064_v40 }
 0xdbd   :  { %v1069_v42 = vadd.f32 %v1065_v41, %v2084_v56 }
 0xdbf   :  { %v1075_v43 = vsel %vm71_vm0, %v1069_v42, 0.0  ;;  %v1083_v44 = vmul.f32 %v1069_v42, %v1069_v42 }
 0xdc0   :  { %1076 = vadd.xlane.f32.xlu1 %v1075_v43 }
 0xdc1   :  { %v1085_v45 = vsel %vm71_vm0, %v1083_v44, 0.0 }
 0xdc2   :  { %v1066_v47 = vpop.f32.mrf.mxu1  ;;  %1086 = vadd.xlane.f32.xlu2 %v1085_v45 }
 0xdc3   :  { %v1067_v48 = vadd.f32 %v1679_v39, %v1066_v47 }
 0xdc5   :  { %v1070_v49 = vadd.f32 %v1067_v48, %v2086_v57 }
 0xdc7   :  { %v1078_v50 = vsel %vm71_vm0, %v1070_v49, 0.0  ;;  %v1084_v51 = vmul.f32 %v1070_v49, %v1070_v49 }
 0xdc8   :  { %1079 = vadd.xlane.f32.xlu0 %v1078_v50 }
 0xdc9   :  { %v1088_v15 = vsel %vm71_vm0, %v1084_v51, 0.0 }
 0xdca   :  { %1089 = vadd.xlane.f32.xlu1 %v1088_v15 }
 0xe33   :  { %v1077_v52 = vpop.xlane.xlu1 %1076 }
 0xe34   :  { %v1081_v56 = vmul.f32 %v1077_v52, %v1906_v14 }
 0xe35   :  { %v1087_v55 = vpop.xlane.xlu2 %1086 }
 0xe36   :  { %v1093_v58 = vmul.f32 %v1081_v56, %v1081_v56  ;;  %v1091_v59 = vmul.f32 %v1087_v55, %v1906_v14  ;;  %v1097_v17 = vsub.f32 %v1069_v42, %v1081_v56 }
 0xe38   :  { %v1095_v57 = vsub.f32 %v1091_v59, %v1093_v58 }
 0xe3a   :  { %v1099_v60 = vadd.f32 1e-12, %v1095_v57 }
 0xe3b   :  { %v1080_v61 = vpop.xlane.xlu0 %1079 }
 0xe3c   :  { %1738 = vrsqrt.f32 %v1099_v60  ;;  %v1082_v62 = vmul.f32 %v1080_v61, %v1906_v14  ;;  %vm1107_vm9 = vweird.f32 %v1099_v60 }
 0xe3d   :  { %v1090_v0 = vpop.xlane.xlu1 %1089 }
 0xe3e   :  { %v1094_v63 = vmul.f32 %v1082_v62, %v1082_v62  ;;  %v1092_v1 = vmul.f32 %v1090_v0, %v1906_v14  ;;  %v1098_v23 = vsub.f32 %v1070_v49, %v1082_v62  ;;  %v1683_v62 = vld [vmem:[%s2263_s13 + $0x1] ss:$0 sm:$0xff] }
 0xe40   :  { %v1096_v2 = vsub.f32 %v1092_v1, %v1094_v63 }
 0xe42   :  { %v1739_v3 = vpop.eup %1738  ;;  %v1100_v4 = vadd.f32 1e-12, %v1096_v2 }
 0xe43   :  { %v1102_v5 = vmul.f32 %v1739_v3, %v1099_v60  ;;  %vm1108_vm8 = vweird.f32 %v1739_v3 }
 0xe44   :  { %1740 = vrsqrt.f32 %v1100_v4  ;;  %vm1109_vm10 = vmor %vm1107_vm9, %vm1108_vm8  ;;  %vm1117_vm13 = vweird.f32 %v1100_v4 }
 0xe45   :  { %v1103_v7 = vmul.f32 %v1739_v3, %v1102_v5 }
 0xe47   :  { %v1104_v8 = vmul.f32 0.5, %v1103_v7 }
 0xe49   :  { %v1105_v9 = vsub.f32 1.5, %v1104_v8 }
 0xe4a   :  { %v1741_v46 = vpop.eup %1740 }
 0xe4b   :  { %v1106_v10 = vmul.f32 %v1739_v3, %v1105_v9  ;;  %v1112_v11 = vmul.f32 %v1741_v46, %v1100_v4  ;;  %vm1118_vm11 = vweird.f32 %v1741_v46 }
 0xe4c   :  { %vm1119_vm14 = vmor %vm1117_vm13, %vm1118_vm11 }
 0xe4d   :  { %v1113_v12 = vmul.f32 %v1741_v46, %v1112_v11  ;;  %v1110_v13 = vsel %vm1109_vm10, %v1739_v3, %v1106_v10 }
 0xe4e   :  { %v1121_v20 = vmul.f32 %v1110_v13, %v1097_v17  ;;  %v1657_v13 = vld [vmem:[%s2266_s16 + $0x8] sm:$0xff] }
 0xe4f   :  { %v1114_v16 = vmul.f32 0.5, %v1113_v12  ;;  %1375 = vmatpush.bf16.msra.mxu0 %v1657_v13 }
 0xe50   :  { %v1126_v22 = vmul.f32 %v1680_v19, %v1121_v20 }
 0xe51   :  { %v1115_v18 = vsub.f32 1.5, %v1114_v16 }
 0xe52   :  { %v1131_v28 = vadd.f32 %v1681_v26, %v1126_v22 }
 0xe53   :  { %v1116_v21 = vmul.f32 %v1741_v46, %v1115_v18 }
 0xe55   :  { %v1120_v24 = vsel %vm1119_vm14, %v1741_v46, %v1116_v21 }
 0xe56   :  { %v1122_v25 = vmul.f32 %v1120_v24, %v1098_v23  ;;  %v1656_v23 = vld [vmem:[%s2266_s16] sm:$0xff] }
 0xe57   :  { %1376 = vmatpush.bf16.msra.mxu0 %v1656_v23 }
 0xe58   :  { %v1127_v27 = vmul.f32 %v1680_v19, %v1122_v25 }
 0xe5a   :  { %v1132_v29 = vadd.f32 %v1681_v26, %v1127_v27 }
 0xe5c   :  { %v1133_v30 = vpack.c.bf16 %v1132_v29, %v1131_v28 }
 0xe5e   :  { %1558 = vmatmul.msk.bf16.vlgmr.msrb.gmra.mxu3 %vm71_vm0, %v1133_v30 }
 0xee1   :  { %v1168_v39 = vpop.f32.mrf.mxu3 }
 0xee2   :  { %v1169_v40 = vadd.f32 %v1682_v37, %v1168_v39 }
 0xee4   :  { %v1173_v41 = vmul.f32 %v1169_v40, %v1169_v40 }
 0xee6   :  { %v1175_v42 = vmul.f32 %v1173_v41, %v1169_v40 }
 0xee8   :  { %v1177_v43 = vmul.f32 0.044715, %v1175_v42  ;;  %v1685_v42 = vld [vmem:[%s2265_s15 + $0x1] ss:$0 sm:$0xff] }
 0xee9   :  { %v1170_v44 = vpop.f32.mrf.mxu3 }
 0xeea   :  { %v1179_v45 = vadd.f32 %v1177_v43, %v1169_v40  ;;  %v1171_v47 = vadd.f32 %v1682_v37, %v1170_v44 }
 0xeec   :  { %v1181_v48 = vmul.f32 0.7978846, %v1179_v45  ;;  %v1174_v49 = vmul.f32 %v1171_v47, %v1171_v47 }
 0xeee   :  { %v1176_v50 = vmul.f32 %v1174_v49, %v1171_v47  ;;  %1742 = vtanh.f32 %v1181_v48 }
 0xef0   :  { %v1178_v51 = vmul.f32 0.044715, %v1176_v50 }
 0xef2   :  { %v1180_v15 = vadd.f32 %v1178_v51, %v1171_v47 }
 0xef4   :  { %v1182_v52 = vmul.f32 0.7978846, %v1180_v15  ;;  %v1743_v56 = vpop.eup %1742 }
 0xef5   :  { %v1185_v55 = vadd.f32 1.0, %v1743_v56 }
 0xef6   :  { %1744 = vtanh.f32 %v1182_v52 }
 0xef7   :  { %v1187_v58 = vmul.f32 0.5, %v1185_v55  ;;  %v1659_v55 = vld [vmem:[%s2268_s18 + $0x8] sm:$0xff] }
 0xef8   :  { %1414 = vmatpush.bf16.msra.mxu1 %v1659_v55 }
 0xef9   :  { %v1189_v54 = vmul.f32 %v1187_v58, %v1169_v40  ;;  %v1686_v58 = vld [vmem:[%s2267_s17] ss:$0 sm:$0xff] }
 0xefc   :  { %v1745_v53 = vpop.eup %1744 }
 0xefd   :  { %v1186_v59 = vadd.f32 1.0, %v1745_v53  ;;  %v1658_v53 = vld [vmem:[%s2268_s18] sm:$0xff]  ;;  %s1427_s18 = sshll.u32 %s1785_s3, 4  ;;  %s1428_s18 = int_to_ptr.vmem [resolvable:$true] %s1427_s18 }
 0xefe   :  { %1415 = vmatpush.bf16.msra.mxu1 %v1658_v53 }
 0xeff   :  { %v1188_v57 = vmul.f32 0.5, %v1186_v59 }
 0xf01   :  { %v1190_v60 = vmul.f32 %v1188_v57, %v1171_v47 }
 0xf03   :  { %v1191_v61 = vpack.c.bf16 %v1190_v60, %v1189_v54 }
 0xf05   :  { %1270 = vmatmul.bf16.vlgmr.msrb.gmra.mxu2 %v1191_v61 }
 0xf88   :  { %v1271_v0 = vpop.f32.mrf.mxu2 }
 0xf89   :  { %v1272_v63 = vadd.f32 %v1683_v62, %v1271_v0  ;;  %v1687_v0 = vld [vmem:[%s2269_s19] ss:$0 sm:$0xff] }
 0xf8b   :  { %v1276_v1 = vadd.f32 %v1272_v63, %v1131_v28 }
 0xf8d   :  { %v1282_v2 = vsel %vm71_vm0, %v1276_v1, 0.0  ;;  %v1290_v46 = vmul.f32 %v1276_v1, %v1276_v1 }
 0xf8e   :  { %1283 = vadd.xlane.f32.xlu1 %v1282_v2 }
 0xf8f   :  { %v1292_v10 = vsel %vm71_vm0, %v1290_v46, 0.0 }
 0xf90   :  { %v1273_v3 = vpop.f32.mrf.mxu2 }
 0xf91   :  { %v1274_v4 = vadd.f32 %v1683_v62, %v1273_v3 }
 0xf93   :  { %v1277_v5 = vadd.f32 %v1274_v4, %v1132_v29 }
 0xf95   :  { %v1285_v7 = vsel %vm71_vm0, %v1277_v5, 0.0  ;;  %v1291_v8 = vmul.f32 %v1277_v5, %v1277_v5 }
 0xf96   :  { %1286 = vadd.xlane.f32.xlu0 %v1285_v7 }
 0xf97   :  { %v1295_v9 = vsel %vm71_vm0, %v1291_v8, 0.0 }
 0xf98   :  { %1296 = vadd.xlane.f32.xlu2 %v1295_v9 }
 0xf9e   :  { %1293 = vadd.xlane.f32.xlu0 %v1292_v10 }
0x1001   :  { %v1284_v16 = vpop.xlane.xlu1 %1283 }
0x1002   :  { %v1288_v20 = vmul.f32 %v1284_v16, %v1906_v14 }
0x1004   :  { %v1300_v25 = vmul.f32 %v1288_v20, %v1288_v20  ;;  %v1304_v45 = vsub.f32 %v1276_v1, %v1288_v20 }
0x1009   :  { %v1287_v11 = vpop.xlane.xlu0 %1286 }
0x100a   :  { %v1289_v12 = vmul.f32 %v1287_v11, %v1906_v14 }
0x100b   :  { %v1297_v17 = vpop.xlane.xlu2 %1296 }
0x100c   :  { %v1301_v18 = vmul.f32 %v1289_v12, %v1289_v12  ;;  %v1299_v19 = vmul.f32 %v1297_v17, %v1906_v14  ;;  %v1305_v37 = vsub.f32 %v1277_v5, %v1289_v12 }
0x100e   :  { %v1303_v21 = vsub.f32 %v1299_v19, %v1301_v18 }
0x1010   :  { %v1307_v24 = vadd.f32 1e-12, %v1303_v21 }
0x1011   :  { %v1294_v22 = vpop.xlane.xlu0 %1293 }
0x1012   :  { %1746 = vrsqrt.f32 %v1307_v24  ;;  %v1298_v26 = vmul.f32 %v1294_v22, %v1906_v14  ;;  %vm1324_vm1 = vweird.f32 %v1307_v24 }
0x1014   :  { %v1302_v27 = vsub.f32 %v1298_v26, %v1300_v25 }
0x1016   :  { %v1306_v28 = vadd.f32 1e-12, %v1302_v27 }
0x1018   :  { %v1747_v29 = vpop.eup %1746  ;;  %1748 = vrsqrt.f32 %v1306_v28  ;;  %vm1314_vm4 = vweird.f32 %v1306_v28 }
0x1019   :  { %v1319_v30 = vmul.f32 %v1747_v29, %v1307_v24  ;;  %vm1325_vm15 = vweird.f32 %v1747_v29 }
0x101a   :  { %vm1326_vm2 = vmor %vm1324_vm1, %vm1325_vm15 }
0x101b   :  { %v1320_v6 = vmul.f32 %v1747_v29, %v1319_v30 }
0x101d   :  { %v1321_v31 = vmul.f32 0.5, %v1320_v6 }
0x101e   :  { %v1749_v32 = vpop.eup %1748 }
0x101f   :  { %v1322_v33 = vsub.f32 1.5, %v1321_v31  ;;  %v1309_v34 = vmul.f32 %v1749_v32, %v1306_v28  ;;  %vm1315_vm3 = vweird.f32 %v1749_v32 }
0x1020   :  { %vm1316_vm5 = vmor %vm1314_vm4, %vm1315_vm3 }
0x1021   :  { %v1323_v35 = vmul.f32 %v1747_v29, %v1322_v33  ;;  %v1310_v36 = vmul.f32 %v1749_v32, %v1309_v34 }
0x1023   :  { %v1327_v14 = vsel %vm1326_vm2, %v1747_v29, %v1323_v35  ;;  %v1311_v39 = vmul.f32 0.5, %v1310_v36 }
0x1024   :  { %v1329_v40 = vmul.f32 %v1327_v14, %v1305_v37 }
0x1025   :  { %v1312_v41 = vsub.f32 1.5, %v1311_v39 }
0x1026   :  { %v1334_v43 = vmul.f32 %v1684_v38, %v1329_v40 }
0x1027   :  { %v1313_v44 = vmul.f32 %v1749_v32, %v1312_v41 }
0x1028   :  { %v1339_v48 = vadd.f32 %v1685_v42, %v1334_v43 }
0x1029   :  { %v1317_v47 = vsel %vm1316_vm5, %v1749_v32, %v1313_v44 }
0x102a   :  { %v1328_v49 = vmul.f32 %v1317_v47, %v1304_v45  ;;  %v1341_v51 = vrot.slane %v1339_v48, 7 }
0x102c   :  { %v1333_v50 = vmul.f32 %v1684_v38, %v1328_v49 }
0x102e   :  { %v1338_v15 = vadd.f32 %v1685_v42, %v1333_v50 }
0x1030   :  { %v1344_v52 = vsel %vm1343_vm6, %v1338_v15, %v1341_v51 }
0x1031   :  { %v1345_v56 = vpack.c.bf16 %v1344_v52, %v1344_v52 }
0x1033   :  { %1618 = vmatmul.msk.bf16.vlgmr.msra.gmra.mxu0 %vm71_vm0, %v1345_v56 }
0x10b0   :  { %v1378_v59 = vpop.f32.mrf.mxu0 }
0x10b1   :  { %v1379_v57 = vadd.f32 %v1686_v58, %v1378_v59 }
0x10b3   :  { %1750 = vtanh.f32 %v1379_v57 }
0x10b8   :  { %v1380_v54 = vpop.f32.mrf.mxu0 }
0x10b9   :  { %v1751_v60 = vpop.eup %1750 }
0x10ba   :  { %v1383_v61 = vmax.f32 %v1751_v60, 0.0 }
0x10bc   :  { %v1384_v62 = vpack.c.bf16 %v1383_v61, %v1383_v61 }
0x10be   :  { %1627 = vmatmul.msk.bf16.vlgmr.msra.gmra.mxu1 %vm71_vm0, %v1384_v62 }
0x113b   :  { %v1417_v63 = vpop.f32.mrf.mxu1 }
0x113c   :  { %v1418_v1 = vadd.f32 %v1687_v0, %v1417_v63 }
0x113e   :  { %1421 = vst [vmem:[#allocation3] sm:$0x3] %v1418_v1 }
0x113f   :  { %1432 = dma.vmem_to_hbm [thread:$0]  %s1428_s18, 32, %s1430_s30, [#allocation4]  }
0x1143   :  { %v1419_v2 = vpop.f32.mrf.mxu1 }
0x1144   :  { %1776 = dma.done.wait [#allocation4], 32  }
0x1145   :  { %1777 = vsyncadd [#allocation4], 4294967264 }
0x1146   :  { %1437 = vsyncpa [#allocation4], 1 }

</bundles_post_ra>
